<compile_context>
chip_gen: v5e
topology: v5e:2x2
jax: 0.10.0
libtpu: 0.0.40
codegen_flags: <defaults>
</compile_context>

<pallas_src>
import functools

import jax
import jax.numpy as jnp
import numpy as np
from jax.experimental import pallas as pl
from jax.experimental.pallas import tpu as pltpu

# LIF constants (LIFLayer defaults-style, deterministic).
ALPHA = 0.9      # membrane decay
BETA = 0.85      # synaptic decay
ALPHARP = 0.65   # refractory decay
WRP = 1.0        # refractory weight
GAIN = 1.0
TAU_M = 1.0 / (1.0 - ALPHA)
TAU_S = 1.0 / (1.0 - BETA)


def _round_up(x, m):
    return ((x + m - 1) // m) * m


def _decolle_kernel(x_ref,
                    w1t_ref, b1_ref, wro1t_ref, bro1_ref,
                    w2t_ref, b2_ref, wro2t_ref, bro2_ref,
                    u_out_ref, r1_out_ref, r2_out_ref,
                    q1, p1, r1, s1, q2, p2, r2, s2,
                    *, tc, t_steps):
    t_chunk = pl.program_id(1)

    tb, nin_p = q1.shape
    h1p = r1.shape[1]
    h2p = r2.shape[1]

    # Hoist bias broadcasts out of the unrolled loop (broadcast_in_dim isn't CSE'd).
    b1b = jnp.broadcast_to(b1_ref[...], (tb, h1p))
    b2b = jnp.broadcast_to(b2_ref[...], (tb, h2p))

    ksyn = TAU_S * GAIN
    krp = (1.0 - ALPHARP) * WRP

    def lif_step(x, st):
        """One DECOLLE step on VALUE-carried state (no ref round trips)."""
        q1v, p1v, r1v, s1v, q2v, p2v, r2v, s2v = st
        # ---- LIF layer 1 ----
        q1n = BETA * q1v + ksyn * x
        p1n = ALPHA * p1v + TAU_M * q1n
        r1n = ALPHARP * r1v - krp * s1v
        u1 = (jnp.dot(p1n, w1t_ref[...], preferred_element_type=jnp.float32)
              + b1b + r1n)
        s1n = (u1 >= 0.0).astype(jnp.float32)
        # ---- LIF layer 2 (input = detached spikes of layer 1) ----
        q2n = BETA * q2v + ksyn * s1n
        p2n = ALPHA * p2v + TAU_M * q2n
        r2n = ALPHARP * r2v - krp * s2v
        u2 = (jnp.dot(p2n, w2t_ref[...], preferred_element_type=jnp.float32)
              + b2b + r2n)
        s2n = (u2 >= 0.0).astype(jnp.float32)
        return (q1n, p1n, r1n, s1n, q2n, p2n, r2n, s2n), (u2, s1n, s2n)

    state_refs = (q1, p1, r1, s1, q2, p2, r2, s2)

    # DECOLLEBase.init(): zero state + one burn-in step on data_batch[:, 0].
    # Done in-kernel so the wrapper needs no extra concatenated copy of x.
    # Relies on grid order (batch outer, time inner): chunk 0 rebuilds state
    # from zeros, so no state leaks across batch blocks.
    @pl.when(t_chunk == 0)
    def _():
        zin = jnp.zeros((tb, nin_p), jnp.float32)
        zh1 = jnp.zeros((tb, h1p), jnp.float32)
        zh2 = jnp.zeros((tb, h2p), jnp.float32)
        st0 = (zin, zin, zh1, zh1, zh1, zh1, zh2, zh2)
        st_burn, _ = lif_step(x_ref[0].astype(jnp.float32), st0)
        for ref, val in zip(state_refs, st_burn):
            ref[...] = val

    # Load state once per chunk, carry in vregs across the unrolled steps.
    st = tuple(ref[...] for ref in state_refs)

    l_last = (t_steps - 1) % tc       # unroll index of the final valid step
    c_last = (t_steps - 1) // tc      # chunk index of the final valid step

    for l in range(tc):
        st, (u2, s1n, s2n) = lif_step(x_ref[l].astype(jnp.float32), st)
        if l == l_last:                      # single static copy of the epilogue
            @pl.when(t_chunk == c_last)
            def _():
                u_out_ref[...] = u2          # forward() return (readout_state='u')
                r1_out_ref[...] = (jnp.dot(s1n, wro1t_ref[...],
                                           preferred_element_type=jnp.float32)
                                   + bro1_ref[...])
                r2_out_ref[...] = (jnp.dot(s2n, wro2t_ref[...],
                                           preferred_element_type=jnp.float32)
                                   + bro2_ref[...])

    # Single writeback of the LIF state per chunk.
    for ref, val in zip(state_refs, st):
        ref[...] = val


@jax.jit
def decolle_forward(x_btn, w1, b1, wro1, bro1, w2, b2, wro2, bro2):
    """x_btn: [B, T, Nin] float32 spike sequence (PyTorch data_batch layout)."""
    B, T, Nin = x_btn.shape
    H1, H2, Nout = w1.shape[0], w2.shape[0], wro2.shape[0]

    # --- pad to hardware tiles: B -> mult of 16 (bf16 x), features -> mult of 128.
    Bp = _round_up(B, 16)
    Ninp = _round_up(Nin, 128)
    H1p = _round_up(H1, 128)
    H2p = _round_up(H2, 128)
    Noutp = _round_up(Nout, 128)

    # Time chunk: up to 32 unrolled steps per grid step with minimal tail pad.
    n_t = -(-T // 32)                  # number of time chunks
    TC = -(-T // n_t)                  # steps per chunk (leading dim: no tiling rule)
    Tp = TC * n_t                      # padded tail steps run after the last store

    # Batch block: only split across TensorCores when each half still keeps the
    # 256-wide MXU busy (review: per-block TB >= 256).  "parallel" is a no-op
    # on single-TC chips; on v7x both halves get a core.
    if Bp >= 512 and Bp % 32 == 0:
        TB = Bp // 2
    else:
        TB = Bp
    n_b = Bp // TB

    # x: one relayout to time-major bf16 (spikes are exactly 0/1 -> lossless;
    # halves the only per-step HBM stream).  Burn-in frame replayed in-kernel,
    # so no concatenate copy.
    x_t = jnp.transpose(x_btn.astype(jnp.bfloat16), (1, 0, 2))       # [T, B, Nin]
    x_t = jnp.pad(x_t, ((0, Tp - T), (0, Bp - B), (0, Ninp - Nin)))

    # Pre-transposed, zero-padded weights (padding rows/cols are zero, so padded
    # features / spiking padded hidden units contribute exactly 0 downstream).
    def pad2(w, r, c):
        return jnp.pad(w, ((0, r - w.shape[0]), (0, c - w.shape[1])))

    w1t = pad2(w1, H1p, Ninp).T          # (Ninp, H1p)
    w2t = pad2(w2, H2p, H1p).T           # (H1p, H2p)
    wro1t = pad2(wro1, Noutp, H1p).T     # (H1p, Noutp)
    wro2t = pad2(wro2, Noutp, H2p).T     # (H2p, Noutp)
    b1r = jnp.pad(b1, (0, H1p - H1)).reshape(1, H1p)
    b2r = jnp.pad(b2, (0, H2p - H2)).reshape(1, H2p)
    bro1r = jnp.pad(bro1, (0, Noutp - Nout)).reshape(1, Noutp)
    bro2r = jnp.pad(bro2, (0, Noutp - Nout)).reshape(1, Noutp)

    kernel = functools.partial(_decolle_kernel, tc=TC, t_steps=T)

    def full(shape):
        n = len(shape)
        return pl.BlockSpec(shape, lambda b, t, _n=n: (0,) * _n)

    u_p, r1_p, r2_p = pl.pallas_call(
        kernel,
        out_shape=(jax.ShapeDtypeStruct((Bp, H2p), jnp.float32),
                   jax.ShapeDtypeStruct((Bp, Noutp), jnp.float32),
                   jax.ShapeDtypeStruct((Bp, Noutp), jnp.float32)),
        grid_spec=pltpu.PrefetchScalarGridSpec(
            num_scalar_prefetch=0,
            grid=(n_b, n_t),                      # batch outer, time inner
            in_specs=[pl.BlockSpec((TC, TB, Ninp), lambda b, t: (t, b, 0)),
                      full(w1t.shape), full(b1r.shape),
                      full(wro1t.shape), full(bro1r.shape),
                      full(w2t.shape), full(b2r.shape),
                      full(wro2t.shape), full(bro2r.shape)],
            out_specs=(pl.BlockSpec((TB, H2p), lambda b, t: (b, 0)),
                       pl.BlockSpec((TB, Noutp), lambda b, t: (b, 0)),
                       pl.BlockSpec((TB, Noutp), lambda b, t: (b, 0))),
            scratch_shapes=[pltpu.VMEM((TB, Ninp), jnp.float32),   # Q1
                            pltpu.VMEM((TB, Ninp), jnp.float32),   # P1
                            pltpu.VMEM((TB, H1p), jnp.float32),    # R1
                            pltpu.VMEM((TB, H1p), jnp.float32),    # S1
                            pltpu.VMEM((TB, H1p), jnp.float32),    # Q2
                            pltpu.VMEM((TB, H1p), jnp.float32),    # P2
                            pltpu.VMEM((TB, H2p), jnp.float32),    # R2
                            pltpu.VMEM((TB, H2p), jnp.float32)]),  # S2
        compiler_params=pltpu.CompilerParams(
            dimension_semantics=("parallel", "arbitrary"),
            vmem_limit_bytes=64 * 1024 * 1024),
    )(x_t, w1t, b1r, wro1t, bro1r, w2t, b2r, wro2t, bro2r)

    # Slice padding back off; padded rows/cols never feed real outputs.
    return u_p[:B, :H2], r1_p[:B, :Nout], r2_p[:B, :Nout]


def _reference_forward(x_btn, w1, b1, wro1, bro1, w2, b2, wro2, bro2):
    """Pure-JAX reference of the same forward semantics (unpadded)."""
    B, T, Nin = x_btn.shape
    H1, H2 = w1.shape[0], w2.shape[0]
    hi = jax.lax.Precision.HIGHEST
    st = [jnp.zeros((B, Nin)), jnp.zeros((B, Nin)),
          jnp.zeros((B, H1)), jnp.zeros((B, H1)),
          jnp.zeros((B, H1)), jnp.zeros((B, H1)),
          jnp.zeros((B, H2)), jnp.zeros((B, H2))]

    def step(st, x):
        Q1, P1, R1, S1, Q2, P2, R2, S2 = st
        Q1 = BETA * Q1 + TAU_S * GAIN * x
        P1 = ALPHA * P1 + TAU_M * Q1
        R1 = ALPHARP * R1 - (1.0 - ALPHARP) * WRP * S1
        U1 = jnp.dot(P1, w1.T, precision=hi) + b1 + R1
        S1 = (U1 >= 0.0).astype(jnp.float32)
        r1o = jnp.dot(S1, wro1.T, precision=hi) + bro1
        Q2 = BETA * Q2 + TAU_S * GAIN * S1
        P2 = ALPHA * P2 + TAU_M * Q2
        R2 = ALPHARP * R2 - (1.0 - ALPHARP) * WRP * S2
        U2 = jnp.dot(P2, w2.T, precision=hi) + b2 + R2
        S2 = (U2 >= 0.0).astype(jnp.float32)
        r2o = jnp.dot(S2, wro2.T, precision=hi) + bro2
        return [Q1, P1, R1, S1, Q2, P2, R2, S2], (U2, r1o, r2o)

    st, outs = step(st, x_btn[:, 0])          # init() burn-in step
    for t in range(T):                        # main loop
        st, outs = step(st, x_btn[:, t])
    return outs


if __name__ == "__main__":
    key = jax.random.PRNGKey(0)
    B, T, Nin, H1, H2, Nout = 2, 8, 32, 32, 32, 16

    ks = jax.random.split(key, 9)

    # Deterministic "PyTorch Linear-like" init: U(-1/sqrt(fan_in), 1/sqrt(fan_in)).
    def lin(k, out_f, in_f):
        kw, kb = jax.random.split(k)
        bound = 1.0 / np.sqrt(in_f)
        w = jax.random.uniform(kw, (out_f, in_f), jnp.float32, -bound, bound)
        b = jax.random.uniform(kb, (out_f,), jnp.float32, -bound, bound)
        return w, b

    w1, b1 = lin(ks[0], H1, Nin)
    wro1, bro1 = lin(ks[1], Nout, H1)
    w2, b2 = lin(ks[2], H2, H1)
    wro2, bro2 = lin(ks[3], Nout, H2)

    # Binary spike inputs, shape [batch, time, input] like PyTorch data_batch.
    x = (jax.random.uniform(ks[4], (B, T, Nin)) < 0.3).astype(jnp.float32)

    u_last, r1_last, r2_last = decolle_forward(
        x, w1, b1, wro1, bro1, w2, b2, wro2, bro2)
    jax.block_until_ready(u_last)

    u_ref, r1_ref, r2_ref = _reference_forward(
        x, w1, b1, wro1, bro1, w2, b2, wro2, bro2)

    np.testing.assert_allclose(np.asarray(u_last), np.asarray(u_ref),
                               rtol=1e-3, atol=1e-3)
    np.testing.assert_allclose(np.asarray(r2_last), np.asarray(r2_ref),
                               rtol=1e-3, atol=1e-3)
    np.testing.assert_allclose(np.asarray(r1_last), np.asarray(r1_ref),
                               rtol=1e-3, atol=1e-3)

    print("KERNEL_OK")
</pallas_src>

<mosaic_0001>
module attributes {stable_mosaic.version = 11 : i64} {
  func.func @_decolle_kernel(%arg0: i32, %arg1: i32, %arg2: memref<8x16x128xbf16, #tpu.memory_space<vmem>>, %arg3: memref<128x128xf32, #tpu.memory_space<vmem>>, %arg4: memref<1x128xf32, #tpu.memory_space<vmem>>, %arg5: memref<128x128xf32, #tpu.memory_space<vmem>>, %arg6: memref<1x128xf32, #tpu.memory_space<vmem>>, %arg7: memref<128x128xf32, #tpu.memory_space<vmem>>, %arg8: memref<1x128xf32, #tpu.memory_space<vmem>>, %arg9: memref<128x128xf32, #tpu.memory_space<vmem>>, %arg10: memref<1x128xf32, #tpu.memory_space<vmem>>, %arg11: memref<16x128xf32, #tpu.memory_space<vmem>>, %arg12: memref<16x128xf32, #tpu.memory_space<vmem>>, %arg13: memref<16x128xf32, #tpu.memory_space<vmem>>, %arg14: memref<16x128xf32, #tpu.memory_space<vmem>>, %arg15: memref<16x128xf32, #tpu.memory_space<vmem>>, %arg16: memref<16x128xf32, #tpu.memory_space<vmem>>, %arg17: memref<16x128xf32, #tpu.memory_space<vmem>>, %arg18: memref<16x128xf32, #tpu.memory_space<vmem>>, %arg19: memref<16x128xf32, #tpu.memory_space<vmem>>, %arg20: memref<16x128xf32, #tpu.memory_space<vmem>>, %arg21: memref<16x128xf32, #tpu.memory_space<vmem>>) attributes {dimension_semantics = [#tpu.dimension_semantics<parallel>, #tpu.dimension_semantics<arbitrary>], iteration_bounds = array<i64: 1, 1>, scalar_prefetch = 0 : i64, scratch_operands = 8 : i64, tpu.core_type = #tpu.core_type<tc>, window_params = [{transform_indices = @transform_0, window_bounds = array<i64: 8, 16, 128>}, {pipeline_mode = #tpu.pipeline_mode<synchronous>, transform_indices = @transform_1, window_bounds = array<i64: 128, 128>}, {pipeline_mode = #tpu.pipeline_mode<synchronous>, transform_indices = @transform_2, window_bounds = array<i64: 1, 128>}, {pipeline_mode = #tpu.pipeline_mode<synchronous>, transform_indices = @transform_3, window_bounds = array<i64: 128, 128>}, {pipeline_mode = #tpu.pipeline_mode<synchronous>, transform_indices = @transform_4, window_bounds = array<i64: 1, 128>}, {pipeline_mode = #tpu.pipeline_mode<synchronous>, transform_indices = @transform_5, window_bounds = array<i64: 128, 128>}, {pipeline_mode = #tpu.pipeline_mode<synchronous>, transform_indices = @transform_6, window_bounds = array<i64: 1, 128>}, {pipeline_mode = #tpu.pipeline_mode<synchronous>, transform_indices = @transform_7, window_bounds = array<i64: 128, 128>}, {pipeline_mode = #tpu.pipeline_mode<synchronous>, transform_indices = @transform_8, window_bounds = array<i64: 1, 128>}, {transform_indices = @transform_9, window_bounds = array<i64: 16, 128>}, {transform_indices = @transform_10, window_bounds = array<i64: 16, 128>}, {transform_indices = @transform_11, window_bounds = array<i64: 16, 128>}]} {
    %c0 = arith.constant 0 : index
    %c0_0 = arith.constant 0 : index
    %0 = vector.load %arg4[%c0, %c0_0] : memref<1x128xf32, #tpu.memory_space<vmem>>, vector<1x128xf32>
    %1 = vector.shape_cast %0 : vector<1x128xf32> to vector<1x128xf32>
    %2 = vector.broadcast %1 : vector<1x128xf32> to vector<16x128xf32>
    %c0_1 = arith.constant 0 : index
    %c0_2 = arith.constant 0 : index
    %3 = vector.load %arg8[%c0_1, %c0_2] : memref<1x128xf32, #tpu.memory_space<vmem>>, vector<1x128xf32>
    %4 = vector.shape_cast %3 : vector<1x128xf32> to vector<1x128xf32>
    %5 = vector.broadcast %4 : vector<1x128xf32> to vector<16x128xf32>
    %c0_i32 = arith.constant 0 : i32
    %6 = arith.cmpi eq, %arg1, %c0_i32 : i32
    %7 = arith.extui %6 : i1 to i32
    %c0_i32_3 = arith.constant 0 : i32
    %8 = arith.cmpi ne, %7, %c0_i32_3 : i32
    scf.if %8 {
      %cst_214 = arith.constant 0.000000e+00 : f32
      %420 = vector.broadcast %cst_214 : f32 to vector<16x128xf32>
      %cst_215 = arith.constant 0.000000e+00 : f32
      %421 = vector.broadcast %cst_215 : f32 to vector<16x128xf32>
      %cst_216 = arith.constant 0.000000e+00 : f32
      %422 = vector.broadcast %cst_216 : f32 to vector<16x128xf32>
      %c0_217 = arith.constant 0 : index
      %c0_218 = arith.constant 0 : index
      %c0_219 = arith.constant 0 : index
      %423 = vector.load %arg2[%c0_217, %c0_218, %c0_219] : memref<8x16x128xbf16, #tpu.memory_space<vmem>>, vector<1x16x128xbf16>
      %424 = vector.shape_cast %423 : vector<1x16x128xbf16> to vector<16x128xbf16>
      %425 = arith.extf %424 : vector<16x128xbf16> to vector<16x128xf32>
      %cst_220 = arith.constant 8.500000e-01 : f32
      %426 = vector.broadcast %cst_220 : f32 to vector<16x128xf32>
      %427 = arith.mulf %426, %420 : vector<16x128xf32>
      %cst_221 = arith.constant 6.66666651 : f32
      %428 = vector.broadcast %cst_221 : f32 to vector<16x128xf32>
      %429 = arith.mulf %428, %425 : vector<16x128xf32>
      %430 = arith.addf %427, %429 : vector<16x128xf32>
      %cst_222 = arith.constant 0.899999976 : f32
      %431 = vector.broadcast %cst_222 : f32 to vector<16x128xf32>
      %432 = arith.mulf %431, %420 : vector<16x128xf32>
      %cst_223 = arith.constant 1.000000e+01 : f32
      %433 = vector.broadcast %cst_223 : f32 to vector<16x128xf32>
      %434 = arith.mulf %433, %430 : vector<16x128xf32>
      %435 = arith.addf %432, %434 : vector<16x128xf32>
      %cst_224 = arith.constant 6.500000e-01 : f32
      %436 = vector.broadcast %cst_224 : f32 to vector<16x128xf32>
      %437 = arith.mulf %436, %421 : vector<16x128xf32>
      %cst_225 = arith.constant 3.500000e-01 : f32
      %438 = vector.broadcast %cst_225 : f32 to vector<16x128xf32>
      %439 = arith.mulf %438, %421 : vector<16x128xf32>
      %440 = arith.subf %437, %439 : vector<16x128xf32>
      %c0_226 = arith.constant 0 : index
      %c0_227 = arith.constant 0 : index
      %441 = vector.load %arg3[%c0_226, %c0_227] : memref<128x128xf32, #tpu.memory_space<vmem>>, vector<128x128xf32>
      %cst_228 = arith.constant dense<0.000000e+00> : vector<16x128xf32>
      %442 = tpu.matmul %435, %441, %cst_228 {dimension_numbers = #tpu.dot_dimension_numbers<[1], [0], [0], [1], [0, 0, 1, 1], [], []>} : vector<16x128xf32>, vector<128x128xf32>, vector<16x128xf32> -> vector<16x128xf32>
      %443 = arith.addf %442, %2 : vector<16x128xf32>
      %444 = arith.addf %443, %440 : vector<16x128xf32>
      %cst_229 = arith.constant 0.000000e+00 : f32
      %445 = vector.broadcast %cst_229 : f32 to vector<16x128xf32>
      %446 = arith.cmpf oge, %444, %445 : vector<16x128xf32>
      %447 = arith.extui %446 : vector<16x128xi1> to vector<16x128xi32>
      %448 = arith.sitofp %447 : vector<16x128xi32> to vector<16x128xf32>
      %cst_230 = arith.constant 8.500000e-01 : f32
      %449 = vector.broadcast %cst_230 : f32 to vector<16x128xf32>
      %450 = arith.mulf %449, %421 : vector<16x128xf32>
      %cst_231 = arith.constant 6.66666651 : f32
      %451 = vector.broadcast %cst_231 : f32 to vector<16x128xf32>
      %452 = arith.mulf %451, %448 : vector<16x128xf32>
      %453 = arith.addf %450, %452 : vector<16x128xf32>
      %cst_232 = arith.constant 0.899999976 : f32
      %454 = vector.broadcast %cst_232 : f32 to vector<16x128xf32>
      %455 = arith.mulf %454, %421 : vector<16x128xf32>
      %cst_233 = arith.constant 1.000000e+01 : f32
      %456 = vector.broadcast %cst_233 : f32 to vector<16x128xf32>
      %457 = arith.mulf %456, %453 : vector<16x128xf32>
      %458 = arith.addf %455, %457 : vector<16x128xf32>
      %cst_234 = arith.constant 6.500000e-01 : f32
      %459 = vector.broadcast %cst_234 : f32 to vector<16x128xf32>
      %460 = arith.mulf %459, %422 : vector<16x128xf32>
      %cst_235 = arith.constant 3.500000e-01 : f32
      %461 = vector.broadcast %cst_235 : f32 to vector<16x128xf32>
      %462 = arith.mulf %461, %422 : vector<16x128xf32>
      %463 = arith.subf %460, %462 : vector<16x128xf32>
      %c0_236 = arith.constant 0 : index
      %c0_237 = arith.constant 0 : index
      %464 = vector.load %arg7[%c0_236, %c0_237] : memref<128x128xf32, #tpu.memory_space<vmem>>, vector<128x128xf32>
      %cst_238 = arith.constant dense<0.000000e+00> : vector<16x128xf32>
      %465 = tpu.matmul %458, %464, %cst_238 {dimension_numbers = #tpu.dot_dimension_numbers<[1], [0], [0], [1], [0, 0, 1, 1], [], []>} : vector<16x128xf32>, vector<128x128xf32>, vector<16x128xf32> -> vector<16x128xf32>
      %466 = arith.addf %465, %5 : vector<16x128xf32>
      %467 = arith.addf %466, %463 : vector<16x128xf32>
      %cst_239 = arith.constant 0.000000e+00 : f32
      %468 = vector.broadcast %cst_239 : f32 to vector<16x128xf32>
      %469 = arith.cmpf oge, %467, %468 : vector<16x128xf32>
      %470 = arith.extui %469 : vector<16x128xi1> to vector<16x128xi32>
      %471 = arith.sitofp %470 : vector<16x128xi32> to vector<16x128xf32>
      %c0_240 = arith.constant 0 : index
      %c0_241 = arith.constant 0 : index
      %472 = vector.load %arg14[%c0_240, %c0_241] : memref<16x128xf32, #tpu.memory_space<vmem>>, vector<16x128xf32>
      tpu.vector_store %arg14[%c0_240, %c0_241], %430 {strides = array<i32>} : memref<16x128xf32, #tpu.memory_space<vmem>>, vector<16x128xf32>,
      %c0_242 = arith.constant 0 : index
      %c0_243 = arith.constant 0 : index
      %473 = vector.load %arg15[%c0_242, %c0_243] : memref<16x128xf32, #tpu.memory_space<vmem>>, vector<16x128xf32>
      tpu.vector_store %arg15[%c0_242, %c0_243], %435 {strides = array<i32>} : memref<16x128xf32, #tpu.memory_space<vmem>>, vector<16x128xf32>,
      %c0_244 = arith.constant 0 : index
      %c0_245 = arith.constant 0 : index
      %474 = vector.load %arg16[%c0_244, %c0_245] : memref<16x128xf32, #tpu.memory_space<vmem>>, vector<16x128xf32>
      tpu.vector_store %arg16[%c0_244, %c0_245], %440 {strides = array<i32>} : memref<16x128xf32, #tpu.memory_space<vmem>>, vector<16x128xf32>,
      %c0_246 = arith.constant 0 : index
      %c0_247 = arith.constant 0 : index
      %475 = vector.load %arg17[%c0_246, %c0_247] : memref<16x128xf32, #tpu.memory_space<vmem>>, vector<16x128xf32>
      tpu.vector_store %arg17[%c0_246, %c0_247], %448 {strides = array<i32>} : memref<16x128xf32, #tpu.memory_space<vmem>>, vector<16x128xf32>,
      %c0_248 = arith.constant 0 : index
      %c0_249 = arith.constant 0 : index
      %476 = vector.load %arg18[%c0_248, %c0_249] : memref<16x128xf32, #tpu.memory_space<vmem>>, vector<16x128xf32>
      tpu.vector_store %arg18[%c0_248, %c0_249], %453 {strides = array<i32>} : memref<16x128xf32, #tpu.memory_space<vmem>>, vector<16x128xf32>,
      %c0_250 = arith.constant 0 : index
      %c0_251 = arith.constant 0 : index
      %477 = vector.load %arg19[%c0_250, %c0_251] : memref<16x128xf32, #tpu.memory_space<vmem>>, vector<16x128xf32>
      tpu.vector_store %arg19[%c0_250, %c0_251], %458 {strides = array<i32>} : memref<16x128xf32, #tpu.memory_space<vmem>>, vector<16x128xf32>,
      %c0_252 = arith.constant 0 : index
      %c0_253 = arith.constant 0 : index
      %478 = vector.load %arg20[%c0_252, %c0_253] : memref<16x128xf32, #tpu.memory_space<vmem>>, vector<16x128xf32>
      tpu.vector_store %arg20[%c0_252, %c0_253], %463 {strides = array<i32>} : memref<16x128xf32, #tpu.memory_space<vmem>>, vector<16x128xf32>,
      %c0_254 = arith.constant 0 : index
      %c0_255 = arith.constant 0 : index
      %479 = vector.load %arg21[%c0_254, %c0_255] : memref<16x128xf32, #tpu.memory_space<vmem>>, vector<16x128xf32>
      tpu.vector_store %arg21[%c0_254, %c0_255], %471 {strides = array<i32>} : memref<16x128xf32, #tpu.memory_space<vmem>>, vector<16x128xf32>,
    } else {
    }
    %c0_4 = arith.constant 0 : index
    %c0_5 = arith.constant 0 : index
    %9 = vector.load %arg14[%c0_4, %c0_5] : memref<16x128xf32, #tpu.memory_space<vmem>>, vector<16x128xf32>
    %c0_6 = arith.constant 0 : index
    %c0_7 = arith.constant 0 : index
    %10 = vector.load %arg15[%c0_6, %c0_7] : memref<16x128xf32, #tpu.memory_space<vmem>>, vector<16x128xf32>
    %c0_8 = arith.constant 0 : index
    %c0_9 = arith.constant 0 : index
    %11 = vector.load %arg16[%c0_8, %c0_9] : memref<16x128xf32, #tpu.memory_space<vmem>>, vector<16x128xf32>
    %c0_10 = arith.constant 0 : index
    %c0_11 = arith.constant 0 : index
    %12 = vector.load %arg17[%c0_10, %c0_11] : memref<16x128xf32, #tpu.memory_space<vmem>>, vector<16x128xf32>
    %c0_12 = arith.constant 0 : index
    %c0_13 = arith.constant 0 : index
    %13 = vector.load %arg18[%c0_12, %c0_13] : memref<16x128xf32, #tpu.memory_space<vmem>>, vector<16x128xf32>
    %c0_14 = arith.constant 0 : index
    %c0_15 = arith.constant 0 : index
    %14 = vector.load %arg19[%c0_14, %c0_15] : memref<16x128xf32, #tpu.memory_space<vmem>>, vector<16x128xf32>
    %c0_16 = arith.constant 0 : index
    %c0_17 = arith.constant 0 : index
    %15 = vector.load %arg20[%c0_16, %c0_17] : memref<16x128xf32, #tpu.memory_space<vmem>>, vector<16x128xf32>
    %c0_18 = arith.constant 0 : index
    %c0_19 = arith.constant 0 : index
    %16 = vector.load %arg21[%c0_18, %c0_19] : memref<16x128xf32, #tpu.memory_space<vmem>>, vector<16x128xf32>
    %c0_20 = arith.constant 0 : index
    %c0_21 = arith.constant 0 : index
    %c0_22 = arith.constant 0 : index
    %17 = vector.load %arg2[%c0_20, %c0_21, %c0_22] : memref<8x16x128xbf16, #tpu.memory_space<vmem>>, vector<1x16x128xbf16>
    %18 = vector.shape_cast %17 : vector<1x16x128xbf16> to vector<16x128xbf16>
    %19 = arith.extf %18 : vector<16x128xbf16> to vector<16x128xf32>
    %cst = arith.constant 8.500000e-01 : f32
    %20 = vector.broadcast %cst : f32 to vector<16x128xf32>
    %21 = arith.mulf %20, %9 : vector<16x128xf32>
    %cst_23 = arith.constant 6.66666651 : f32
    %22 = vector.broadcast %cst_23 : f32 to vector<16x128xf32>
    %23 = arith.mulf %22, %19 : vector<16x128xf32>
    %24 = arith.addf %21, %23 : vector<16x128xf32>
    %cst_24 = arith.constant 0.899999976 : f32
    %25 = vector.broadcast %cst_24 : f32 to vector<16x128xf32>
    %26 = arith.mulf %25, %10 : vector<16x128xf32>
    %cst_25 = arith.constant 1.000000e+01 : f32
    %27 = vector.broadcast %cst_25 : f32 to vector<16x128xf32>
    %28 = arith.mulf %27, %24 : vector<16x128xf32>
    %29 = arith.addf %26, %28 : vector<16x128xf32>
    %cst_26 = arith.constant 6.500000e-01 : f32
    %30 = vector.broadcast %cst_26 : f32 to vector<16x128xf32>
    %31 = arith.mulf %30, %11 : vector<16x128xf32>
    %cst_27 = arith.constant 3.500000e-01 : f32
    %32 = vector.broadcast %cst_27 : f32 to vector<16x128xf32>
    %33 = arith.mulf %32, %12 : vector<16x128xf32>
    %34 = arith.subf %31, %33 : vector<16x128xf32>
    %c0_28 = arith.constant 0 : index
    %c0_29 = arith.constant 0 : index
    %35 = vector.load %arg3[%c0_28, %c0_29] : memref<128x128xf32, #tpu.memory_space<vmem>>, vector<128x128xf32>
    %cst_30 = arith.constant dense<0.000000e+00> : vector<16x128xf32>
    %36 = tpu.matmul %29, %35, %cst_30 {dimension_numbers = #tpu.dot_dimension_numbers<[1], [0], [0], [1], [0, 0, 1, 1], [], []>} : vector<16x128xf32>, vector<128x128xf32>, vector<16x128xf32> -> vector<16x128xf32>
    %37 = arith.addf %36, %2 : vector<16x128xf32>
    %38 = arith.addf %37, %34 : vector<16x128xf32>
    %cst_31 = arith.constant 0.000000e+00 : f32
    %39 = vector.broadcast %cst_31 : f32 to vector<16x128xf32>
    %40 = arith.cmpf oge, %38, %39 : vector<16x128xf32>
    %41 = arith.extui %40 : vector<16x128xi1> to vector<16x128xi32>
    %42 = arith.sitofp %41 : vector<16x128xi32> to vector<16x128xf32>
    %cst_32 = arith.constant 8.500000e-01 : f32
    %43 = vector.broadcast %cst_32 : f32 to vector<16x128xf32>
    %44 = arith.mulf %43, %13 : vector<16x128xf32>
    %cst_33 = arith.constant 6.66666651 : f32
    %45 = vector.broadcast %cst_33 : f32 to vector<16x128xf32>
    %46 = arith.mulf %45, %42 : vector<16x128xf32>
    %47 = arith.addf %44, %46 : vector<16x128xf32>
    %cst_34 = arith.constant 0.899999976 : f32
    %48 = vector.broadcast %cst_34 : f32 to vector<16x128xf32>
    %49 = arith.mulf %48, %14 : vector<16x128xf32>
    %cst_35 = arith.constant 1.000000e+01 : f32
    %50 = vector.broadcast %cst_35 : f32 to vector<16x128xf32>
    %51 = arith.mulf %50, %47 : vector<16x128xf32>
    %52 = arith.addf %49, %51 : vector<16x128xf32>
    %cst_36 = arith.constant 6.500000e-01 : f32
    %53 = vector.broadcast %cst_36 : f32 to vector<16x128xf32>
    %54 = arith.mulf %53, %15 : vector<16x128xf32>
    %cst_37 = arith.constant 3.500000e-01 : f32
    %55 = vector.broadcast %cst_37 : f32 to vector<16x128xf32>
    %56 = arith.mulf %55, %16 : vector<16x128xf32>
    %57 = arith.subf %54, %56 : vector<16x128xf32>
    %c0_38 = arith.constant 0 : index
    %c0_39 = arith.constant 0 : index
    %58 = vector.load %arg7[%c0_38, %c0_39] : memref<128x128xf32, #tpu.memory_space<vmem>>, vector<128x128xf32>
    %cst_40 = arith.constant dense<0.000000e+00> : vector<16x128xf32>
    %59 = tpu.matmul %52, %58, %cst_40 {dimension_numbers = #tpu.dot_dimension_numbers<[1], [0], [0], [1], [0, 0, 1, 1], [], []>} : vector<16x128xf32>, vector<128x128xf32>, vector<16x128xf32> -> vector<16x128xf32>
    %60 = arith.addf %59, %5 : vector<16x128xf32>
    %61 = arith.addf %60, %57 : vector<16x128xf32>
    %cst_41 = arith.constant 0.000000e+00 : f32
    %62 = vector.broadcast %cst_41 : f32 to vector<16x128xf32>
    %63 = arith.cmpf oge, %61, %62 : vector<16x128xf32>
    %64 = arith.extui %63 : vector<16x128xi1> to vector<16x128xi32>
    %65 = arith.sitofp %64 : vector<16x128xi32> to vector<16x128xf32>
    %c1 = arith.constant 1 : index
    %c0_42 = arith.constant 0 : index
    %c0_43 = arith.constant 0 : index
    %66 = vector.load %arg2[%c1, %c0_42, %c0_43] : memref<8x16x128xbf16, #tpu.memory_space<vmem>>, vector<1x16x128xbf16>
    %67 = vector.shape_cast %66 : vector<1x16x128xbf16> to vector<16x128xbf16>
    %68 = arith.extf %67 : vector<16x128xbf16> to vector<16x128xf32>
    %cst_44 = arith.constant 8.500000e-01 : f32
    %69 = vector.broadcast %cst_44 : f32 to vector<16x128xf32>
    %70 = arith.mulf %69, %24 : vector<16x128xf32>
    %cst_45 = arith.constant 6.66666651 : f32
    %71 = vector.broadcast %cst_45 : f32 to vector<16x128xf32>
    %72 = arith.mulf %71, %68 : vector<16x128xf32>
    %73 = arith.addf %70, %72 : vector<16x128xf32>
    %cst_46 = arith.constant 0.899999976 : f32
    %74 = vector.broadcast %cst_46 : f32 to vector<16x128xf32>
    %75 = arith.mulf %74, %29 : vector<16x128xf32>
    %cst_47 = arith.constant 1.000000e+01 : f32
    %76 = vector.broadcast %cst_47 : f32 to vector<16x128xf32>
    %77 = arith.mulf %76, %73 : vector<16x128xf32>
    %78 = arith.addf %75, %77 : vector<16x128xf32>
    %cst_48 = arith.constant 6.500000e-01 : f32
    %79 = vector.broadcast %cst_48 : f32 to vector<16x128xf32>
    %80 = arith.mulf %79, %34 : vector<16x128xf32>
    %cst_49 = arith.constant 3.500000e-01 : f32
    %81 = vector.broadcast %cst_49 : f32 to vector<16x128xf32>
    %82 = arith.mulf %81, %42 : vector<16x128xf32>
    %83 = arith.subf %80, %82 : vector<16x128xf32>
    %c0_50 = arith.constant 0 : index
    %c0_51 = arith.constant 0 : index
    %84 = vector.load %arg3[%c0_50, %c0_51] : memref<128x128xf32, #tpu.memory_space<vmem>>, vector<128x128xf32>
    %cst_52 = arith.constant dense<0.000000e+00> : vector<16x128xf32>
    %85 = tpu.matmul %78, %84, %cst_52 {dimension_numbers = #tpu.dot_dimension_numbers<[1], [0], [0], [1], [0, 0, 1, 1], [], []>} : vector<16x128xf32>, vector<128x128xf32>, vector<16x128xf32> -> vector<16x128xf32>
    %86 = arith.addf %85, %2 : vector<16x128xf32>
    %87 = arith.addf %86, %83 : vector<16x128xf32>
    %cst_53 = arith.constant 0.000000e+00 : f32
    %88 = vector.broadcast %cst_53 : f32 to vector<16x128xf32>
    %89 = arith.cmpf oge, %87, %88 : vector<16x128xf32>
    %90 = arith.extui %89 : vector<16x128xi1> to vector<16x128xi32>
    %91 = arith.sitofp %90 : vector<16x128xi32> to vector<16x128xf32>
    %cst_54 = arith.constant 8.500000e-01 : f32
    %92 = vector.broadcast %cst_54 : f32 to vector<16x128xf32>
    %93 = arith.mulf %92, %47 : vector<16x128xf32>
    %cst_55 = arith.constant 6.66666651 : f32
    %94 = vector.broadcast %cst_55 : f32 to vector<16x128xf32>
    %95 = arith.mulf %94, %91 : vector<16x128xf32>
    %96 = arith.addf %93, %95 : vector<16x128xf32>
    %cst_56 = arith.constant 0.899999976 : f32
    %97 = vector.broadcast %cst_56 : f32 to vector<16x128xf32>
    %98 = arith.mulf %97, %52 : vector<16x128xf32>
    %cst_57 = arith.constant 1.000000e+01 : f32
    %99 = vector.broadcast %cst_57 : f32 to vector<16x128xf32>
    %100 = arith.mulf %99, %96 : vector<16x128xf32>
    %101 = arith.addf %98, %100 : vector<16x128xf32>
    %cst_58 = arith.constant 6.500000e-01 : f32
    %102 = vector.broadcast %cst_58 : f32 to vector<16x128xf32>
    %103 = arith.mulf %102, %57 : vector<16x128xf32>
    %cst_59 = arith.constant 3.500000e-01 : f32
    %104 = vector.broadcast %cst_59 : f32 to vector<16x128xf32>
    %105 = arith.mulf %104, %65 : vector<16x128xf32>
    %106 = arith.subf %103, %105 : vector<16x128xf32>
    %c0_60 = arith.constant 0 : index
    %c0_61 = arith.constant 0 : index
    %107 = vector.load %arg7[%c0_60, %c0_61] : memref<128x128xf32, #tpu.memory_space<vmem>>, vector<128x128xf32>
    %cst_62 = arith.constant dense<0.000000e+00> : vector<16x128xf32>
    %108 = tpu.matmul %101, %107, %cst_62 {dimension_numbers = #tpu.dot_dimension_numbers<[1], [0], [0], [1], [0, 0, 1, 1], [], []>} : vector<16x128xf32>, vector<128x128xf32>, vector<16x128xf32> -> vector<16x128xf32>
    %109 = arith.addf %108, %5 : vector<16x128xf32>
    %110 = arith.addf %109, %106 : vector<16x128xf32>
    %cst_63 = arith.constant 0.000000e+00 : f32
    %111 = vector.broadcast %cst_63 : f32 to vector<16x128xf32>
    %112 = arith.cmpf oge, %110, %111 : vector<16x128xf32>
    %113 = arith.extui %112 : vector<16x128xi1> to vector<16x128xi32>
    %114 = arith.sitofp %113 : vector<16x128xi32> to vector<16x128xf32>
    %c2 = arith.constant 2 : index
    %c0_64 = arith.constant 0 : index
    %c0_65 = arith.constant 0 : index
    %115 = vector.load %arg2[%c2, %c0_64, %c0_65] : memref<8x16x128xbf16, #tpu.memory_space<vmem>>, vector<1x16x128xbf16>
    %116 = vector.shape_cast %115 : vector<1x16x128xbf16> to vector<16x128xbf16>
    %117 = arith.extf %116 : vector<16x128xbf16> to vector<16x128xf32>
    %cst_66 = arith.constant 8.500000e-01 : f32
    %118 = vector.broadcast %cst_66 : f32 to vector<16x128xf32>
    %119 = arith.mulf %118, %73 : vector<16x128xf32>
    %cst_67 = arith.constant 6.66666651 : f32
    %120 = vector.broadcast %cst_67 : f32 to vector<16x128xf32>
    %121 = arith.mulf %120, %117 : vector<16x128xf32>
    %122 = arith.addf %119, %121 : vector<16x128xf32>
    %cst_68 = arith.constant 0.899999976 : f32
    %123 = vector.broadcast %cst_68 : f32 to vector<16x128xf32>
    %124 = arith.mulf %123, %78 : vector<16x128xf32>
    %cst_69 = arith.constant 1.000000e+01 : f32
    %125 = vector.broadcast %cst_69 : f32 to vector<16x128xf32>
    %126 = arith.mulf %125, %122 : vector<16x128xf32>
    %127 = arith.addf %124, %126 : vector<16x128xf32>
    %cst_70 = arith.constant 6.500000e-01 : f32
    %128 = vector.broadcast %cst_70 : f32 to vector<16x128xf32>
    %129 = arith.mulf %128, %83 : vector<16x128xf32>
    %cst_71 = arith.constant 3.500000e-01 : f32
    %130 = vector.broadcast %cst_71 : f32 to vector<16x128xf32>
    %131 = arith.mulf %130, %91 : vector<16x128xf32>
    %132 = arith.subf %129, %131 : vector<16x128xf32>
    %c0_72 = arith.constant 0 : index
    %c0_73 = arith.constant 0 : index
    %133 = vector.load %arg3[%c0_72, %c0_73] : memref<128x128xf32, #tpu.memory_space<vmem>>, vector<128x128xf32>
    %cst_74 = arith.constant dense<0.000000e+00> : vector<16x128xf32>
    %134 = tpu.matmul %127, %133, %cst_74 {dimension_numbers = #tpu.dot_dimension_numbers<[1], [0], [0], [1], [0, 0, 1, 1], [], []>} : vector<16x128xf32>, vector<128x128xf32>, vector<16x128xf32> -> vector<16x128xf32>
    %135 = arith.addf %134, %2 : vector<16x128xf32>
    %136 = arith.addf %135, %132 : vector<16x128xf32>
    %cst_75 = arith.constant 0.000000e+00 : f32
    %137 = vector.broadcast %cst_75 : f32 to vector<16x128xf32>
    %138 = arith.cmpf oge, %136, %137 : vector<16x128xf32>
    %139 = arith.extui %138 : vector<16x128xi1> to vector<16x128xi32>
    %140 = arith.sitofp %139 : vector<16x128xi32> to vector<16x128xf32>
    %cst_76 = arith.constant 8.500000e-01 : f32
    %141 = vector.broadcast %cst_76 : f32 to vector<16x128xf32>
    %142 = arith.mulf %141, %96 : vector<16x128xf32>
    %cst_77 = arith.constant 6.66666651 : f32
    %143 = vector.broadcast %cst_77 : f32 to vector<16x128xf32>
    %144 = arith.mulf %143, %140 : vector<16x128xf32>
    %145 = arith.addf %142, %144 : vector<16x128xf32>
    %cst_78 = arith.constant 0.899999976 : f32
    %146 = vector.broadcast %cst_78 : f32 to vector<16x128xf32>
    %147 = arith.mulf %146, %101 : vector<16x128xf32>
    %cst_79 = arith.constant 1.000000e+01 : f32
    %148 = vector.broadcast %cst_79 : f32 to vector<16x128xf32>
    %149 = arith.mulf %148, %145 : vector<16x128xf32>
    %150 = arith.addf %147, %149 : vector<16x128xf32>
    %cst_80 = arith.constant 6.500000e-01 : f32
    %151 = vector.broadcast %cst_80 : f32 to vector<16x128xf32>
    %152 = arith.mulf %151, %106 : vector<16x128xf32>
    %cst_81 = arith.constant 3.500000e-01 : f32
    %153 = vector.broadcast %cst_81 : f32 to vector<16x128xf32>
    %154 = arith.mulf %153, %114 : vector<16x128xf32>
    %155 = arith.subf %152, %154 : vector<16x128xf32>
    %c0_82 = arith.constant 0 : index
    %c0_83 = arith.constant 0 : index
    %156 = vector.load %arg7[%c0_82, %c0_83] : memref<128x128xf32, #tpu.memory_space<vmem>>, vector<128x128xf32>
    %cst_84 = arith.constant dense<0.000000e+00> : vector<16x128xf32>
    %157 = tpu.matmul %150, %156, %cst_84 {dimension_numbers = #tpu.dot_dimension_numbers<[1], [0], [0], [1], [0, 0, 1, 1], [], []>} : vector<16x128xf32>, vector<128x128xf32>, vector<16x128xf32> -> vector<16x128xf32>
    %158 = arith.addf %157, %5 : vector<16x128xf32>
    %159 = arith.addf %158, %155 : vector<16x128xf32>
    %cst_85 = arith.constant 0.000000e+00 : f32
    %160 = vector.broadcast %cst_85 : f32 to vector<16x128xf32>
    %161 = arith.cmpf oge, %159, %160 : vector<16x128xf32>
    %162 = arith.extui %161 : vector<16x128xi1> to vector<16x128xi32>
    %163 = arith.sitofp %162 : vector<16x128xi32> to vector<16x128xf32>
    %c3 = arith.constant 3 : index
    %c0_86 = arith.constant 0 : index
    %c0_87 = arith.constant 0 : index
    %164 = vector.load %arg2[%c3, %c0_86, %c0_87] : memref<8x16x128xbf16, #tpu.memory_space<vmem>>, vector<1x16x128xbf16>
    %165 = vector.shape_cast %164 : vector<1x16x128xbf16> to vector<16x128xbf16>
    %166 = arith.extf %165 : vector<16x128xbf16> to vector<16x128xf32>
    %cst_88 = arith.constant 8.500000e-01 : f32
    %167 = vector.broadcast %cst_88 : f32 to vector<16x128xf32>
    %168 = arith.mulf %167, %122 : vector<16x128xf32>
    %cst_89 = arith.constant 6.66666651 : f32
    %169 = vector.broadcast %cst_89 : f32 to vector<16x128xf32>
    %170 = arith.mulf %169, %166 : vector<16x128xf32>
    %171 = arith.addf %168, %170 : vector<16x128xf32>
    %cst_90 = arith.constant 0.899999976 : f32
    %172 = vector.broadcast %cst_90 : f32 to vector<16x128xf32>
    %173 = arith.mulf %172, %127 : vector<16x128xf32>
    %cst_91 = arith.constant 1.000000e+01 : f32
    %174 = vector.broadcast %cst_91 : f32 to vector<16x128xf32>
    %175 = arith.mulf %174, %171 : vector<16x128xf32>
    %176 = arith.addf %173, %175 : vector<16x128xf32>
    %cst_92 = arith.constant 6.500000e-01 : f32
    %177 = vector.broadcast %cst_92 : f32 to vector<16x128xf32>
    %178 = arith.mulf %177, %132 : vector<16x128xf32>
    %cst_93 = arith.constant 3.500000e-01 : f32
    %179 = vector.broadcast %cst_93 : f32 to vector<16x128xf32>
    %180 = arith.mulf %179, %140 : vector<16x128xf32>
    %181 = arith.subf %178, %180 : vector<16x128xf32>
    %c0_94 = arith.constant 0 : index
    %c0_95 = arith.constant 0 : index
    %182 = vector.load %arg3[%c0_94, %c0_95] : memref<128x128xf32, #tpu.memory_space<vmem>>, vector<128x128xf32>
    %cst_96 = arith.constant dense<0.000000e+00> : vector<16x128xf32>
    %183 = tpu.matmul %176, %182, %cst_96 {dimension_numbers = #tpu.dot_dimension_numbers<[1], [0], [0], [1], [0, 0, 1, 1], [], []>} : vector<16x128xf32>, vector<128x128xf32>, vector<16x128xf32> -> vector<16x128xf32>
    %184 = arith.addf %183, %2 : vector<16x128xf32>
    %185 = arith.addf %184, %181 : vector<16x128xf32>
    %cst_97 = arith.constant 0.000000e+00 : f32
    %186 = vector.broadcast %cst_97 : f32 to vector<16x128xf32>
    %187 = arith.cmpf oge, %185, %186 : vector<16x128xf32>
    %188 = arith.extui %187 : vector<16x128xi1> to vector<16x128xi32>
    %189 = arith.sitofp %188 : vector<16x128xi32> to vector<16x128xf32>
    %cst_98 = arith.constant 8.500000e-01 : f32
    %190 = vector.broadcast %cst_98 : f32 to vector<16x128xf32>
    %191 = arith.mulf %190, %145 : vector<16x128xf32>
    %cst_99 = arith.constant 6.66666651 : f32
    %192 = vector.broadcast %cst_99 : f32 to vector<16x128xf32>
    %193 = arith.mulf %192, %189 : vector<16x128xf32>
    %194 = arith.addf %191, %193 : vector<16x128xf32>
    %cst_100 = arith.constant 0.899999976 : f32
    %195 = vector.broadcast %cst_100 : f32 to vector<16x128xf32>
    %196 = arith.mulf %195, %150 : vector<16x128xf32>
    %cst_101 = arith.constant 1.000000e+01 : f32
    %197 = vector.broadcast %cst_101 : f32 to vector<16x128xf32>
    %198 = arith.mulf %197, %194 : vector<16x128xf32>
    %199 = arith.addf %196, %198 : vector<16x128xf32>
    %cst_102 = arith.constant 6.500000e-01 : f32
    %200 = vector.broadcast %cst_102 : f32 to vector<16x128xf32>
    %201 = arith.mulf %200, %155 : vector<16x128xf32>
    %cst_103 = arith.constant 3.500000e-01 : f32
    %202 = vector.broadcast %cst_103 : f32 to vector<16x128xf32>
    %203 = arith.mulf %202, %163 : vector<16x128xf32>
    %204 = arith.subf %201, %203 : vector<16x128xf32>
    %c0_104 = arith.constant 0 : index
    %c0_105 = arith.constant 0 : index
    %205 = vector.load %arg7[%c0_104, %c0_105] : memref<128x128xf32, #tpu.memory_space<vmem>>, vector<128x128xf32>
    %cst_106 = arith.constant dense<0.000000e+00> : vector<16x128xf32>
    %206 = tpu.matmul %199, %205, %cst_106 {dimension_numbers = #tpu.dot_dimension_numbers<[1], [0], [0], [1], [0, 0, 1, 1], [], []>} : vector<16x128xf32>, vector<128x128xf32>, vector<16x128xf32> -> vector<16x128xf32>
    %207 = arith.addf %206, %5 : vector<16x128xf32>
    %208 = arith.addf %207, %204 : vector<16x128xf32>
    %cst_107 = arith.constant 0.000000e+00 : f32
    %209 = vector.broadcast %cst_107 : f32 to vector<16x128xf32>
    %210 = arith.cmpf oge, %208, %209 : vector<16x128xf32>
    %211 = arith.extui %210 : vector<16x128xi1> to vector<16x128xi32>
    %212 = arith.sitofp %211 : vector<16x128xi32> to vector<16x128xf32>
    %c4 = arith.constant 4 : index
    %c0_108 = arith.constant 0 : index
    %c0_109 = arith.constant 0 : index
    %213 = vector.load %arg2[%c4, %c0_108, %c0_109] : memref<8x16x128xbf16, #tpu.memory_space<vmem>>, vector<1x16x128xbf16>
    %214 = vector.shape_cast %213 : vector<1x16x128xbf16> to vector<16x128xbf16>
    %215 = arith.extf %214 : vector<16x128xbf16> to vector<16x128xf32>
    %cst_110 = arith.constant 8.500000e-01 : f32
    %216 = vector.broadcast %cst_110 : f32 to vector<16x128xf32>
    %217 = arith.mulf %216, %171 : vector<16x128xf32>
    %cst_111 = arith.constant 6.66666651 : f32
    %218 = vector.broadcast %cst_111 : f32 to vector<16x128xf32>
    %219 = arith.mulf %218, %215 : vector<16x128xf32>
    %220 = arith.addf %217, %219 : vector<16x128xf32>
    %cst_112 = arith.constant 0.899999976 : f32
    %221 = vector.broadcast %cst_112 : f32 to vector<16x128xf32>
    %222 = arith.mulf %221, %176 : vector<16x128xf32>
    %cst_113 = arith.constant 1.000000e+01 : f32
    %223 = vector.broadcast %cst_113 : f32 to vector<16x128xf32>
    %224 = arith.mulf %223, %220 : vector<16x128xf32>
    %225 = arith.addf %222, %224 : vector<16x128xf32>
    %cst_114 = arith.constant 6.500000e-01 : f32
    %226 = vector.broadcast %cst_114 : f32 to vector<16x128xf32>
    %227 = arith.mulf %226, %181 : vector<16x128xf32>
    %cst_115 = arith.constant 3.500000e-01 : f32
    %228 = vector.broadcast %cst_115 : f32 to vector<16x128xf32>
    %229 = arith.mulf %228, %189 : vector<16x128xf32>
    %230 = arith.subf %227, %229 : vector<16x128xf32>
    %c0_116 = arith.constant 0 : index
    %c0_117 = arith.constant 0 : index
    %231 = vector.load %arg3[%c0_116, %c0_117] : memref<128x128xf32, #tpu.memory_space<vmem>>, vector<128x128xf32>
    %cst_118 = arith.constant dense<0.000000e+00> : vector<16x128xf32>
    %232 = tpu.matmul %225, %231, %cst_118 {dimension_numbers = #tpu.dot_dimension_numbers<[1], [0], [0], [1], [0, 0, 1, 1], [], []>} : vector<16x128xf32>, vector<128x128xf32>, vector<16x128xf32> -> vector<16x128xf32>
    %233 = arith.addf %232, %2 : vector<16x128xf32>
    %234 = arith.addf %233, %230 : vector<16x128xf32>
    %cst_119 = arith.constant 0.000000e+00 : f32
    %235 = vector.broadcast %cst_119 : f32 to vector<16x128xf32>
    %236 = arith.cmpf oge, %234, %235 : vector<16x128xf32>
    %237 = arith.extui %236 : vector<16x128xi1> to vector<16x128xi32>
    %238 = arith.sitofp %237 : vector<16x128xi32> to vector<16x128xf32>
    %cst_120 = arith.constant 8.500000e-01 : f32
    %239 = vector.broadcast %cst_120 : f32 to vector<16x128xf32>
    %240 = arith.mulf %239, %194 : vector<16x128xf32>
    %cst_121 = arith.constant 6.66666651 : f32
    %241 = vector.broadcast %cst_121 : f32 to vector<16x128xf32>
    %242 = arith.mulf %241, %238 : vector<16x128xf32>
    %243 = arith.addf %240, %242 : vector<16x128xf32>
    %cst_122 = arith.constant 0.899999976 : f32
    %244 = vector.broadcast %cst_122 : f32 to vector<16x128xf32>
    %245 = arith.mulf %244, %199 : vector<16x128xf32>
    %cst_123 = arith.constant 1.000000e+01 : f32
    %246 = vector.broadcast %cst_123 : f32 to vector<16x128xf32>
    %247 = arith.mulf %246, %243 : vector<16x128xf32>
    %248 = arith.addf %245, %247 : vector<16x128xf32>
    %cst_124 = arith.constant 6.500000e-01 : f32
    %249 = vector.broadcast %cst_124 : f32 to vector<16x128xf32>
    %250 = arith.mulf %249, %204 : vector<16x128xf32>
    %cst_125 = arith.constant 3.500000e-01 : f32
    %251 = vector.broadcast %cst_125 : f32 to vector<16x128xf32>
    %252 = arith.mulf %251, %212 : vector<16x128xf32>
    %253 = arith.subf %250, %252 : vector<16x128xf32>
    %c0_126 = arith.constant 0 : index
    %c0_127 = arith.constant 0 : index
    %254 = vector.load %arg7[%c0_126, %c0_127] : memref<128x128xf32, #tpu.memory_space<vmem>>, vector<128x128xf32>
    %cst_128 = arith.constant dense<0.000000e+00> : vector<16x128xf32>
    %255 = tpu.matmul %248, %254, %cst_128 {dimension_numbers = #tpu.dot_dimension_numbers<[1], [0], [0], [1], [0, 0, 1, 1], [], []>} : vector<16x128xf32>, vector<128x128xf32>, vector<16x128xf32> -> vector<16x128xf32>
    %256 = arith.addf %255, %5 : vector<16x128xf32>
    %257 = arith.addf %256, %253 : vector<16x128xf32>
    %cst_129 = arith.constant 0.000000e+00 : f32
    %258 = vector.broadcast %cst_129 : f32 to vector<16x128xf32>
    %259 = arith.cmpf oge, %257, %258 : vector<16x128xf32>
    %260 = arith.extui %259 : vector<16x128xi1> to vector<16x128xi32>
    %261 = arith.sitofp %260 : vector<16x128xi32> to vector<16x128xf32>
    %c5 = arith.constant 5 : index
    %c0_130 = arith.constant 0 : index
    %c0_131 = arith.constant 0 : index
    %262 = vector.load %arg2[%c5, %c0_130, %c0_131] : memref<8x16x128xbf16, #tpu.memory_space<vmem>>, vector<1x16x128xbf16>
    %263 = vector.shape_cast %262 : vector<1x16x128xbf16> to vector<16x128xbf16>
    %264 = arith.extf %263 : vector<16x128xbf16> to vector<16x128xf32>
    %cst_132 = arith.constant 8.500000e-01 : f32
    %265 = vector.broadcast %cst_132 : f32 to vector<16x128xf32>
    %266 = arith.mulf %265, %220 : vector<16x128xf32>
    %cst_133 = arith.constant 6.66666651 : f32
    %267 = vector.broadcast %cst_133 : f32 to vector<16x128xf32>
    %268 = arith.mulf %267, %264 : vector<16x128xf32>
    %269 = arith.addf %266, %268 : vector<16x128xf32>
    %cst_134 = arith.constant 0.899999976 : f32
    %270 = vector.broadcast %cst_134 : f32 to vector<16x128xf32>
    %271 = arith.mulf %270, %225 : vector<16x128xf32>
    %cst_135 = arith.constant 1.000000e+01 : f32
    %272 = vector.broadcast %cst_135 : f32 to vector<16x128xf32>
    %273 = arith.mulf %272, %269 : vector<16x128xf32>
    %274 = arith.addf %271, %273 : vector<16x128xf32>
    %cst_136 = arith.constant 6.500000e-01 : f32
    %275 = vector.broadcast %cst_136 : f32 to vector<16x128xf32>
    %276 = arith.mulf %275, %230 : vector<16x128xf32>
    %cst_137 = arith.constant 3.500000e-01 : f32
    %277 = vector.broadcast %cst_137 : f32 to vector<16x128xf32>
    %278 = arith.mulf %277, %238 : vector<16x128xf32>
    %279 = arith.subf %276, %278 : vector<16x128xf32>
    %c0_138 = arith.constant 0 : index
    %c0_139 = arith.constant 0 : index
    %280 = vector.load %arg3[%c0_138, %c0_139] : memref<128x128xf32, #tpu.memory_space<vmem>>, vector<128x128xf32>
    %cst_140 = arith.constant dense<0.000000e+00> : vector<16x128xf32>
    %281 = tpu.matmul %274, %280, %cst_140 {dimension_numbers = #tpu.dot_dimension_numbers<[1], [0], [0], [1], [0, 0, 1, 1], [], []>} : vector<16x128xf32>, vector<128x128xf32>, vector<16x128xf32> -> vector<16x128xf32>
    %282 = arith.addf %281, %2 : vector<16x128xf32>
    %283 = arith.addf %282, %279 : vector<16x128xf32>
    %cst_141 = arith.constant 0.000000e+00 : f32
    %284 = vector.broadcast %cst_141 : f32 to vector<16x128xf32>
    %285 = arith.cmpf oge, %283, %284 : vector<16x128xf32>
    %286 = arith.extui %285 : vector<16x128xi1> to vector<16x128xi32>
    %287 = arith.sitofp %286 : vector<16x128xi32> to vector<16x128xf32>
    %cst_142 = arith.constant 8.500000e-01 : f32
    %288 = vector.broadcast %cst_142 : f32 to vector<16x128xf32>
    %289 = arith.mulf %288, %243 : vector<16x128xf32>
    %cst_143 = arith.constant 6.66666651 : f32
    %290 = vector.broadcast %cst_143 : f32 to vector<16x128xf32>
    %291 = arith.mulf %290, %287 : vector<16x128xf32>
    %292 = arith.addf %289, %291 : vector<16x128xf32>
    %cst_144 = arith.constant 0.899999976 : f32
    %293 = vector.broadcast %cst_144 : f32 to vector<16x128xf32>
    %294 = arith.mulf %293, %248 : vector<16x128xf32>
    %cst_145 = arith.constant 1.000000e+01 : f32
    %295 = vector.broadcast %cst_145 : f32 to vector<16x128xf32>
    %296 = arith.mulf %295, %292 : vector<16x128xf32>
    %297 = arith.addf %294, %296 : vector<16x128xf32>
    %cst_146 = arith.constant 6.500000e-01 : f32
    %298 = vector.broadcast %cst_146 : f32 to vector<16x128xf32>
    %299 = arith.mulf %298, %253 : vector<16x128xf32>
    %cst_147 = arith.constant 3.500000e-01 : f32
    %300 = vector.broadcast %cst_147 : f32 to vector<16x128xf32>
    %301 = arith.mulf %300, %261 : vector<16x128xf32>
    %302 = arith.subf %299, %301 : vector<16x128xf32>
    %c0_148 = arith.constant 0 : index
    %c0_149 = arith.constant 0 : index
    %303 = vector.load %arg7[%c0_148, %c0_149] : memref<128x128xf32, #tpu.memory_space<vmem>>, vector<128x128xf32>
    %cst_150 = arith.constant dense<0.000000e+00> : vector<16x128xf32>
    %304 = tpu.matmul %297, %303, %cst_150 {dimension_numbers = #tpu.dot_dimension_numbers<[1], [0], [0], [1], [0, 0, 1, 1], [], []>} : vector<16x128xf32>, vector<128x128xf32>, vector<16x128xf32> -> vector<16x128xf32>
    %305 = arith.addf %304, %5 : vector<16x128xf32>
    %306 = arith.addf %305, %302 : vector<16x128xf32>
    %cst_151 = arith.constant 0.000000e+00 : f32
    %307 = vector.broadcast %cst_151 : f32 to vector<16x128xf32>
    %308 = arith.cmpf oge, %306, %307 : vector<16x128xf32>
    %309 = arith.extui %308 : vector<16x128xi1> to vector<16x128xi32>
    %310 = arith.sitofp %309 : vector<16x128xi32> to vector<16x128xf32>
    %c6 = arith.constant 6 : index
    %c0_152 = arith.constant 0 : index
    %c0_153 = arith.constant 0 : index
    %311 = vector.load %arg2[%c6, %c0_152, %c0_153] : memref<8x16x128xbf16, #tpu.memory_space<vmem>>, vector<1x16x128xbf16>
    %312 = vector.shape_cast %311 : vector<1x16x128xbf16> to vector<16x128xbf16>
    %313 = arith.extf %312 : vector<16x128xbf16> to vector<16x128xf32>
    %cst_154 = arith.constant 8.500000e-01 : f32
    %314 = vector.broadcast %cst_154 : f32 to vector<16x128xf32>
    %315 = arith.mulf %314, %269 : vector<16x128xf32>
    %cst_155 = arith.constant 6.66666651 : f32
    %316 = vector.broadcast %cst_155 : f32 to vector<16x128xf32>
    %317 = arith.mulf %316, %313 : vector<16x128xf32>
    %318 = arith.addf %315, %317 : vector<16x128xf32>
    %cst_156 = arith.constant 0.899999976 : f32
    %319 = vector.broadcast %cst_156 : f32 to vector<16x128xf32>
    %320 = arith.mulf %319, %274 : vector<16x128xf32>
    %cst_157 = arith.constant 1.000000e+01 : f32
    %321 = vector.broadcast %cst_157 : f32 to vector<16x128xf32>
    %322 = arith.mulf %321, %318 : vector<16x128xf32>
    %323 = arith.addf %320, %322 : vector<16x128xf32>
    %cst_158 = arith.constant 6.500000e-01 : f32
    %324 = vector.broadcast %cst_158 : f32 to vector<16x128xf32>
    %325 = arith.mulf %324, %279 : vector<16x128xf32>
    %cst_159 = arith.constant 3.500000e-01 : f32
    %326 = vector.broadcast %cst_159 : f32 to vector<16x128xf32>
    %327 = arith.mulf %326, %287 : vector<16x128xf32>
    %328 = arith.subf %325, %327 : vector<16x128xf32>
    %c0_160 = arith.constant 0 : index
    %c0_161 = arith.constant 0 : index
    %329 = vector.load %arg3[%c0_160, %c0_161] : memref<128x128xf32, #tpu.memory_space<vmem>>, vector<128x128xf32>
    %cst_162 = arith.constant dense<0.000000e+00> : vector<16x128xf32>
    %330 = tpu.matmul %323, %329, %cst_162 {dimension_numbers = #tpu.dot_dimension_numbers<[1], [0], [0], [1], [0, 0, 1, 1], [], []>} : vector<16x128xf32>, vector<128x128xf32>, vector<16x128xf32> -> vector<16x128xf32>
    %331 = arith.addf %330, %2 : vector<16x128xf32>
    %332 = arith.addf %331, %328 : vector<16x128xf32>
    %cst_163 = arith.constant 0.000000e+00 : f32
    %333 = vector.broadcast %cst_163 : f32 to vector<16x128xf32>
    %334 = arith.cmpf oge, %332, %333 : vector<16x128xf32>
    %335 = arith.extui %334 : vector<16x128xi1> to vector<16x128xi32>
    %336 = arith.sitofp %335 : vector<16x128xi32> to vector<16x128xf32>
    %cst_164 = arith.constant 8.500000e-01 : f32
    %337 = vector.broadcast %cst_164 : f32 to vector<16x128xf32>
    %338 = arith.mulf %337, %292 : vector<16x128xf32>
    %cst_165 = arith.constant 6.66666651 : f32
    %339 = vector.broadcast %cst_165 : f32 to vector<16x128xf32>
    %340 = arith.mulf %339, %336 : vector<16x128xf32>
    %341 = arith.addf %338, %340 : vector<16x128xf32>
    %cst_166 = arith.constant 0.899999976 : f32
    %342 = vector.broadcast %cst_166 : f32 to vector<16x128xf32>
    %343 = arith.mulf %342, %297 : vector<16x128xf32>
    %cst_167 = arith.constant 1.000000e+01 : f32
    %344 = vector.broadcast %cst_167 : f32 to vector<16x128xf32>
    %345 = arith.mulf %344, %341 : vector<16x128xf32>
    %346 = arith.addf %343, %345 : vector<16x128xf32>
    %cst_168 = arith.constant 6.500000e-01 : f32
    %347 = vector.broadcast %cst_168 : f32 to vector<16x128xf32>
    %348 = arith.mulf %347, %302 : vector<16x128xf32>
    %cst_169 = arith.constant 3.500000e-01 : f32
    %349 = vector.broadcast %cst_169 : f32 to vector<16x128xf32>
    %350 = arith.mulf %349, %310 : vector<16x128xf32>
    %351 = arith.subf %348, %350 : vector<16x128xf32>
    %c0_170 = arith.constant 0 : index
    %c0_171 = arith.constant 0 : index
    %352 = vector.load %arg7[%c0_170, %c0_171] : memref<128x128xf32, #tpu.memory_space<vmem>>, vector<128x128xf32>
    %cst_172 = arith.constant dense<0.000000e+00> : vector<16x128xf32>
    %353 = tpu.matmul %346, %352, %cst_172 {dimension_numbers = #tpu.dot_dimension_numbers<[1], [0], [0], [1], [0, 0, 1, 1], [], []>} : vector<16x128xf32>, vector<128x128xf32>, vector<16x128xf32> -> vector<16x128xf32>
    %354 = arith.addf %353, %5 : vector<16x128xf32>
    %355 = arith.addf %354, %351 : vector<16x128xf32>
    %cst_173 = arith.constant 0.000000e+00 : f32
    %356 = vector.broadcast %cst_173 : f32 to vector<16x128xf32>
    %357 = arith.cmpf oge, %355, %356 : vector<16x128xf32>
    %358 = arith.extui %357 : vector<16x128xi1> to vector<16x128xi32>
    %359 = arith.sitofp %358 : vector<16x128xi32> to vector<16x128xf32>
    %c7 = arith.constant 7 : index
    %c0_174 = arith.constant 0 : index
    %c0_175 = arith.constant 0 : index
    %360 = vector.load %arg2[%c7, %c0_174, %c0_175] : memref<8x16x128xbf16, #tpu.memory_space<vmem>>, vector<1x16x128xbf16>
    %361 = vector.shape_cast %360 : vector<1x16x128xbf16> to vector<16x128xbf16>
    %362 = arith.extf %361 : vector<16x128xbf16> to vector<16x128xf32>
    %cst_176 = arith.constant 8.500000e-01 : f32
    %363 = vector.broadcast %cst_176 : f32 to vector<16x128xf32>
    %364 = arith.mulf %363, %318 : vector<16x128xf32>
    %cst_177 = arith.constant 6.66666651 : f32
    %365 = vector.broadcast %cst_177 : f32 to vector<16x128xf32>
    %366 = arith.mulf %365, %362 : vector<16x128xf32>
    %367 = arith.addf %364, %366 : vector<16x128xf32>
    %cst_178 = arith.constant 0.899999976 : f32
    %368 = vector.broadcast %cst_178 : f32 to vector<16x128xf32>
    %369 = arith.mulf %368, %323 : vector<16x128xf32>
    %cst_179 = arith.constant 1.000000e+01 : f32
    %370 = vector.broadcast %cst_179 : f32 to vector<16x128xf32>
    %371 = arith.mulf %370, %367 : vector<16x128xf32>
    %372 = arith.addf %369, %371 : vector<16x128xf32>
    %cst_180 = arith.constant 6.500000e-01 : f32
    %373 = vector.broadcast %cst_180 : f32 to vector<16x128xf32>
    %374 = arith.mulf %373, %328 : vector<16x128xf32>
    %cst_181 = arith.constant 3.500000e-01 : f32
    %375 = vector.broadcast %cst_181 : f32 to vector<16x128xf32>
    %376 = arith.mulf %375, %336 : vector<16x128xf32>
    %377 = arith.subf %374, %376 : vector<16x128xf32>
    %c0_182 = arith.constant 0 : index
    %c0_183 = arith.constant 0 : index
    %378 = vector.load %arg3[%c0_182, %c0_183] : memref<128x128xf32, #tpu.memory_space<vmem>>, vector<128x128xf32>
    %cst_184 = arith.constant dense<0.000000e+00> : vector<16x128xf32>
    %379 = tpu.matmul %372, %378, %cst_184 {dimension_numbers = #tpu.dot_dimension_numbers<[1], [0], [0], [1], [0, 0, 1, 1], [], []>} : vector<16x128xf32>, vector<128x128xf32>, vector<16x128xf32> -> vector<16x128xf32>
    %380 = arith.addf %379, %2 : vector<16x128xf32>
    %381 = arith.addf %380, %377 : vector<16x128xf32>
    %cst_185 = arith.constant 0.000000e+00 : f32
    %382 = vector.broadcast %cst_185 : f32 to vector<16x128xf32>
    %383 = arith.cmpf oge, %381, %382 : vector<16x128xf32>
    %384 = arith.extui %383 : vector<16x128xi1> to vector<16x128xi32>
    %385 = arith.sitofp %384 : vector<16x128xi32> to vector<16x128xf32>
    %cst_186 = arith.constant 8.500000e-01 : f32
    %386 = vector.broadcast %cst_186 : f32 to vector<16x128xf32>
    %387 = arith.mulf %386, %341 : vector<16x128xf32>
    %cst_187 = arith.constant 6.66666651 : f32
    %388 = vector.broadcast %cst_187 : f32 to vector<16x128xf32>
    %389 = arith.mulf %388, %385 : vector<16x128xf32>
    %390 = arith.addf %387, %389 : vector<16x128xf32>
    %cst_188 = arith.constant 0.899999976 : f32
    %391 = vector.broadcast %cst_188 : f32 to vector<16x128xf32>
    %392 = arith.mulf %391, %346 : vector<16x128xf32>
    %cst_189 = arith.constant 1.000000e+01 : f32
    %393 = vector.broadcast %cst_189 : f32 to vector<16x128xf32>
    %394 = arith.mulf %393, %390 : vector<16x128xf32>
    %395 = arith.addf %392, %394 : vector<16x128xf32>
    %cst_190 = arith.constant 6.500000e-01 : f32
    %396 = vector.broadcast %cst_190 : f32 to vector<16x128xf32>
    %397 = arith.mulf %396, %351 : vector<16x128xf32>
    %cst_191 = arith.constant 3.500000e-01 : f32
    %398 = vector.broadcast %cst_191 : f32 to vector<16x128xf32>
    %399 = arith.mulf %398, %359 : vector<16x128xf32>
    %400 = arith.subf %397, %399 : vector<16x128xf32>
    %c0_192 = arith.constant 0 : index
    %c0_193 = arith.constant 0 : index
    %401 = vector.load %arg7[%c0_192, %c0_193] : memref<128x128xf32, #tpu.memory_space<vmem>>, vector<128x128xf32>
    %cst_194 = arith.constant dense<0.000000e+00> : vector<16x128xf32>
    %402 = tpu.matmul %395, %401, %cst_194 {dimension_numbers = #tpu.dot_dimension_numbers<[1], [0], [0], [1], [0, 0, 1, 1], [], []>} : vector<16x128xf32>, vector<128x128xf32>, vector<16x128xf32> -> vector<16x128xf32>
    %403 = arith.addf %402, %5 : vector<16x128xf32>
    %404 = arith.addf %403, %400 : vector<16x128xf32>
    %cst_195 = arith.constant 0.000000e+00 : f32
    %405 = vector.broadcast %cst_195 : f32 to vector<16x128xf32>
    %406 = arith.cmpf oge, %404, %405 : vector<16x128xf32>
    %407 = arith.extui %406 : vector<16x128xi1> to vector<16x128xi32>
    %408 = arith.sitofp %407 : vector<16x128xi32> to vector<16x128xf32>
    %c0_i32_196 = arith.constant 0 : i32
    %409 = arith.cmpi eq, %arg1, %c0_i32_196 : i32
    %410 = arith.extui %409 : i1 to i32
    %c0_i32_197 = arith.constant 0 : i32
    %411 = arith.cmpi ne, %410, %c0_i32_197 : i32
    scf.if %411 {
      %c0_214 = arith.constant 0 : index
      %c0_215 = arith.constant 0 : index
      %420 = vector.load %arg11[%c0_214, %c0_215] : memref<16x128xf32, #tpu.memory_space<vmem>>, vector<16x128xf32>
      tpu.vector_store %arg11[%c0_214, %c0_215], %404 {strides = array<i32>} : memref<16x128xf32, #tpu.memory_space<vmem>>, vector<16x128xf32>,
      %c0_216 = arith.constant 0 : index
      %c0_217 = arith.constant 0 : index
      %421 = vector.load %arg5[%c0_216, %c0_217] : memref<128x128xf32, #tpu.memory_space<vmem>>, vector<128x128xf32>
      %cst_218 = arith.constant dense<0.000000e+00> : vector<16x128xf32>
      %422 = tpu.matmul %385, %421, %cst_218 {dimension_numbers = #tpu.dot_dimension_numbers<[1], [0], [0], [1], [0, 0, 1, 1], [], []>} : vector<16x128xf32>, vector<128x128xf32>, vector<16x128xf32> -> vector<16x128xf32>
      %c0_219 = arith.constant 0 : index
      %c0_220 = arith.constant 0 : index
      %423 = vector.load %arg6[%c0_219, %c0_220] : memref<1x128xf32, #tpu.memory_space<vmem>>, vector<1x128xf32>
      %424 = vector.broadcast %423 : vector<1x128xf32> to vector<16x128xf32>
      %425 = arith.addf %422, %424 : vector<16x128xf32>
      %c0_221 = arith.constant 0 : index
      %c0_222 = arith.constant 0 : index
      %426 = vector.load %arg12[%c0_221, %c0_222] : memref<16x128xf32, #tpu.memory_space<vmem>>, vector<16x128xf32>
      tpu.vector_store %arg12[%c0_221, %c0_222], %425 {strides = array<i32>} : memref<16x128xf32, #tpu.memory_space<vmem>>, vector<16x128xf32>,
      %c0_223 = arith.constant 0 : index
      %c0_224 = arith.constant 0 : index
      %427 = vector.load %arg9[%c0_223, %c0_224] : memref<128x128xf32, #tpu.memory_space<vmem>>, vector<128x128xf32>
      %cst_225 = arith.constant dense<0.000000e+00> : vector<16x128xf32>
      %428 = tpu.matmul %408, %427, %cst_225 {dimension_numbers = #tpu.dot_dimension_numbers<[1], [0], [0], [1], [0, 0, 1, 1], [], []>} : vector<16x128xf32>, vector<128x128xf32>, vector<16x128xf32> -> vector<16x128xf32>
      %c0_226 = arith.constant 0 : index
      %c0_227 = arith.constant 0 : index
      %429 = vector.load %arg10[%c0_226, %c0_227] : memref<1x128xf32, #tpu.memory_space<vmem>>, vector<1x128xf32>
      %430 = vector.broadcast %429 : vector<1x128xf32> to vector<16x128xf32>
      %431 = arith.addf %428, %430 : vector<16x128xf32>
      %c0_228 = arith.constant 0 : index
      %c0_229 = arith.constant 0 : index
      %432 = vector.load %arg13[%c0_228, %c0_229] : memref<16x128xf32, #tpu.memory_space<vmem>>, vector<16x128xf32>
      tpu.vector_store %arg13[%c0_228, %c0_229], %431 {strides = array<i32>} : memref<16x128xf32, #tpu.memory_space<vmem>>, vector<16x128xf32>,
    } else {
    }
    %c0_198 = arith.constant 0 : index
    %c0_199 = arith.constant 0 : index
    %412 = vector.load %arg14[%c0_198, %c0_199] : memref<16x128xf32, #tpu.memory_space<vmem>>, vector<16x128xf32>
    tpu.vector_store %arg14[%c0_198, %c0_199], %367 {strides = array<i32>} : memref<16x128xf32, #tpu.memory_space<vmem>>, vector<16x128xf32>,
    %c0_200 = arith.constant 0 : index
    %c0_201 = arith.constant 0 : index
    %413 = vector.load %arg15[%c0_200, %c0_201] : memref<16x128xf32, #tpu.memory_space<vmem>>, vector<16x128xf32>
    tpu.vector_store %arg15[%c0_200, %c0_201], %372 {strides = array<i32>} : memref<16x128xf32, #tpu.memory_space<vmem>>, vector<16x128xf32>,
    %c0_202 = arith.constant 0 : index
    %c0_203 = arith.constant 0 : index
    %414 = vector.load %arg16[%c0_202, %c0_203] : memref<16x128xf32, #tpu.memory_space<vmem>>, vector<16x128xf32>
    tpu.vector_store %arg16[%c0_202, %c0_203], %377 {strides = array<i32>} : memref<16x128xf32, #tpu.memory_space<vmem>>, vector<16x128xf32>,
    %c0_204 = arith.constant 0 : index
    %c0_205 = arith.constant 0 : index
    %415 = vector.load %arg17[%c0_204, %c0_205] : memref<16x128xf32, #tpu.memory_space<vmem>>, vector<16x128xf32>
    tpu.vector_store %arg17[%c0_204, %c0_205], %385 {strides = array<i32>} : memref<16x128xf32, #tpu.memory_space<vmem>>, vector<16x128xf32>,
    %c0_206 = arith.constant 0 : index
    %c0_207 = arith.constant 0 : index
    %416 = vector.load %arg18[%c0_206, %c0_207] : memref<16x128xf32, #tpu.memory_space<vmem>>, vector<16x128xf32>
    tpu.vector_store %arg18[%c0_206, %c0_207], %390 {strides = array<i32>} : memref<16x128xf32, #tpu.memory_space<vmem>>, vector<16x128xf32>,
    %c0_208 = arith.constant 0 : index
    %c0_209 = arith.constant 0 : index
    %417 = vector.load %arg19[%c0_208, %c0_209] : memref<16x128xf32, #tpu.memory_space<vmem>>, vector<16x128xf32>
    tpu.vector_store %arg19[%c0_208, %c0_209], %395 {strides = array<i32>} : memref<16x128xf32, #tpu.memory_space<vmem>>, vector<16x128xf32>,
    %c0_210 = arith.constant 0 : index
    %c0_211 = arith.constant 0 : index
    %418 = vector.load %arg20[%c0_210, %c0_211] : memref<16x128xf32, #tpu.memory_space<vmem>>, vector<16x128xf32>
    tpu.vector_store %arg20[%c0_210, %c0_211], %400 {strides = array<i32>} : memref<16x128xf32, #tpu.memory_space<vmem>>, vector<16x128xf32>,
    %c0_212 = arith.constant 0 : index
    %c0_213 = arith.constant 0 : index
    %419 = vector.load %arg21[%c0_212, %c0_213] : memref<16x128xf32, #tpu.memory_space<vmem>>, vector<16x128xf32>
    tpu.vector_store %arg21[%c0_212, %c0_213], %408 {strides = array<i32>} : memref<16x128xf32, #tpu.memory_space<vmem>>, vector<16x128xf32>,
    return
  }
  func.func @transform_0(%arg0: i32, %arg1: i32) -> (i32, i32, i32) {
    %c0_i32 = arith.constant 0 : i32
    %c0_i32_0 = arith.constant 0 : i32
    return %arg1, %arg0, %c0_i32 : i32, i32, i32
  }
  func.func @transform_1(%arg0: i32, %arg1: i32) -> (i32, i32) {
    %c0_i32 = arith.constant 0 : i32
    %c0_i32_0 = arith.constant 0 : i32
    %c0_i32_1 = arith.constant 0 : i32
    return %c0_i32, %c0_i32_0 : i32, i32
  }
  func.func @transform_2(%arg0: i32, %arg1: i32) -> (i32, i32) {
    %c0_i32 = arith.constant 0 : i32
    %c0_i32_0 = arith.constant 0 : i32
    %c0_i32_1 = arith.constant 0 : i32
    return %c0_i32, %c0_i32_0 : i32, i32
  }
  func.func @transform_3(%arg0: i32, %arg1: i32) -> (i32, i32) {
    %c0_i32 = arith.constant 0 : i32
    %c0_i32_0 = arith.constant 0 : i32
    %c0_i32_1 = arith.constant 0 : i32
    return %c0_i32, %c0_i32_0 : i32, i32
  }
  func.func @transform_4(%arg0: i32, %arg1: i32) -> (i32, i32) {
    %c0_i32 = arith.constant 0 : i32
    %c0_i32_0 = arith.constant 0 : i32
    %c0_i32_1 = arith.constant 0 : i32
    return %c0_i32, %c0_i32_0 : i32, i32
  }
  func.func @transform_5(%arg0: i32, %arg1: i32) -> (i32, i32) {
    %c0_i32 = arith.constant 0 : i32
    %c0_i32_0 = arith.constant 0 : i32
    %c0_i32_1 = arith.constant 0 : i32
    return %c0_i32, %c0_i32_0 : i32, i32
  }
  func.func @transform_6(%arg0: i32, %arg1: i32) -> (i32, i32) {
    %c0_i32 = arith.constant 0 : i32
    %c0_i32_0 = arith.constant 0 : i32
    %c0_i32_1 = arith.constant 0 : i32
    return %c0_i32, %c0_i32_0 : i32, i32
  }
  func.func @transform_7(%arg0: i32, %arg1: i32) -> (i32, i32) {
    %c0_i32 = arith.constant 0 : i32
    %c0_i32_0 = arith.constant 0 : i32
    %c0_i32_1 = arith.constant 0 : i32
    return %c0_i32, %c0_i32_0 : i32, i32
  }
  func.func @transform_8(%arg0: i32, %arg1: i32) -> (i32, i32) {
    %c0_i32 = arith.constant 0 : i32
    %c0_i32_0 = arith.constant 0 : i32
    %c0_i32_1 = arith.constant 0 : i32
    return %c0_i32, %c0_i32_0 : i32, i32
  }
  func.func @transform_9(%arg0: i32, %arg1: i32) -> (i32, i32) {
    %c0_i32 = arith.constant 0 : i32
    %c0_i32_0 = arith.constant 0 : i32
    return %arg0, %c0_i32 : i32, i32
  }
  func.func @transform_10(%arg0: i32, %arg1: i32) -> (i32, i32) {
    %c0_i32 = arith.constant 0 : i32
    %c0_i32_0 = arith.constant 0 : i32
    return %arg0, %c0_i32 : i32, i32
  }
  func.func @transform_11(%arg0: i32, %arg1: i32) -> (i32, i32) {
    %c0_i32 = arith.constant 0 : i32
    %c0_i32_0 = arith.constant 0 : i32
    return %arg0, %c0_i32 : i32, i32
  }
}

</mosaic_0001>

<bundles_post_ra>
// kernel: decolle_forward.1
= control target key start
LH: loop header
LB: loop body
LE: loop exit
PB: predicated region body
PF: predicated region fallthrough
CT: control target
= control target key end

     0   :  { %s2052_s1 = inlined_call_operand.vmem [shape: f32[128,128], index: 1, kind: input, shape index: {}]   ;;  %s2053_s0 = inlined_call_operand.vmem [shape: bf16[8,16,128], index: 0, kind: input, shape index: {}]   ;;  %s2054_s2 = inlined_call_operand.vmem [shape: f32[1,128], index: 2, kind: input, shape index: {}]   ;;  %s2055_s5 = inlined_call_operand.vmem [shape: f32[128,128], index: 5, kind: input, shape index: {}]   ;;  %s2056_s6 = inlined_call_operand.vmem [shape: f32[1,128], index: 6, kind: input, shape index: {}]   ;;  %s2057_s3 = inlined_call_operand.vmem [shape: f32[128,128], index: 3, kind: input, shape index: {}]   ;;  %s2058_s4 = inlined_call_operand.vmem [shape: f32[1,128], index: 4, kind: input, shape index: {}]   ;;  %s2059_s8 = inlined_call_operand.vmem [shape: f32[1,128], index: 8, kind: input, shape index: {}]   ;;  %s2060_s7 = inlined_call_operand.vmem [shape: f32[128,128], index: 7, kind: input, shape index: {}]   ;;  %s2061_s10 = inlined_call_operand.vmem [shape: f32[16,128], index: 10, kind: output, shape index: {1}]   ;;  %s2062_s9 = inlined_call_operand.vmem [shape: f32[16,128], index: 9, kind: output, shape index: {0}]   ;;  %s2063_s11 = inlined_call_operand.vmem [shape: f32[16,128], index: 11, kind: output, shape index: {2}]  }
   0x1   :  { %v1339_v0 = vld [vmem:[%s2052_s1 + $0x78] sm:$0xff]  ;;  %v1344_v1 = vld [vmem:[%s2052_s1 + $0x70] sm:$0xff]  ;;  %v1351_v2 = vld [vmem:[%s2052_s1 + $0x68] sm:$0xff] }
   0x2   :  { %75 = vmatpush.msra.mxu0 %v1339_v0  ;;  %231 = vmatpush.msra.mxu2 %v1339_v0  ;;  %v1358_v3 = vld [vmem:[%s2052_s1 + $0x60] sm:$0xff]  ;;  %v1365_v4 = vld [vmem:[%s2052_s1 + $0x58] sm:$0xff]  ;;  %v1375_v6 = vld [vmem:[%s2052_s1 + $0x50] sm:$0xff] }
   0x3   :  { %v1226_v5 = vld [vmem:[%s2053_s0] sm:$0xff]   ;;  %v1382_v8 = vld [vmem:[%s2052_s1 + $0x48] sm:$0xff]  ;;  %v1396_v11 = vld [vmem:[%s2052_s1 + $0x38] sm:$0xff] }
   0x4   :  { %76 = vmatpush.msra.mxu0 %v1344_v1  ;;  %232 = vmatpush.msra.mxu2 %v1344_v1  ;;  %v1227_v7 = vunpack.c.l.bf16 %v1226_v5  ;;  %v1389_v9 = vld [vmem:[%s2052_s1 + $0x40] sm:$0xff]  ;;  %v1403_v12 = vld [vmem:[%s2052_s1 + $0x30] sm:$0xff]  ;;  %v1228_v14 = vunpack.c.h.bf16 %v1226_v5  ;;  %v1410_v15 = vld [vmem:[%s2052_s1 + $0x28] sm:$0xff] }
   0x5   :  { %v1417_v16 = vld [vmem:[%s2052_s1 + $0x20] sm:$0xff]  ;;  %v1424_v20 = vld [vmem:[%s2052_s1 + $0x18] sm:$0xff]  ;;  %v1431_v21 = vld [vmem:[%s2052_s1 + $0x10] sm:$0xff] }
   0x6   :  { %77 = vmatpush.msra.mxu0 %v1351_v2  ;;  %233 = vmatpush.msra.mxu2 %v1351_v2  ;;  %v51_v10 = vmul.f32 6.6666665, %v1227_v7  ;;  %v52_v19 = vmul.f32 6.6666665, %v1228_v14  ;;  %v1438_v25 = vld [vmem:[%s2052_s1 + $0x8] sm:$0xff]  ;;  %v1445_v26 = vld [vmem:[%s2052_s1] sm:$0xff] }
   0x7   :  { %v1261_v30 = vld [vmem:[%s2053_s0 + $0x8] sm:$0xff]   ;;  %v1262_v37 = vld [vmem:[%s2053_s0 + $0x10] sm:$0xff]   ;;  %v1263_v62 = vld [vmem:[%s2053_s0 + $0x18] sm:$0xff]  }
   0x8   :  { %78 = vmatpush.msra.mxu0 %v1358_v3  ;;  %234 = vmatpush.msra.mxu2 %v1358_v3  ;;  %v197_v13 = vmul.f32 0.85, %v51_v10  ;;  %v55_v17 = vmul.f32 10.0, %v51_v10  ;;  %v198_v24 = vmul.f32 0.85, %v52_v19  ;;  %v56_v28 = vmul.f32 10.0, %v52_v19 }
   0x9   :  { %v1235_v33 = vunpack.c.l.bf16 %v1261_v30  ;;  %v1239_v39 = vunpack.c.l.bf16 %v1262_v37  ;;  %v1236_v40 = vunpack.c.h.bf16 %v1261_v30  ;;  %v1240_v50 = vunpack.c.h.bf16 %v1262_v37 }
   0xa   :  { %79 = vmatpush.msra.mxu0 %v1365_v4  ;;  %235 = vmatpush.msra.mxu2 %v1365_v4  ;;  %v201_v18 = vadd.f32 %v197_v13, %v51_v10  ;;  %v203_v22 = vmul.f32 0.9, %v55_v17  ;;  %v202_v29 = vadd.f32 %v198_v24, %v52_v19  ;;  %v204_v31 = vmul.f32 0.9, %v56_v28  ;;  %v1264_v13 = vld [vmem:[%s2053_s0 + $0x20] sm:$0xff]  }
   0xb   :  { %v334_v36 = vmul.f32 6.6666665, %v1235_v33  ;;  %v437_v44 = vmul.f32 6.6666665, %v1239_v39  ;;  %v335_v46 = vmul.f32 6.6666665, %v1236_v40  ;;  %v1243_v63 = vunpack.c.l.bf16 %v1263_v62 }
   0xc   :  { %80 = vmatpush.msra.mxu0 %v1375_v6  ;;  %236 = vmatpush.msra.mxu2 %v1375_v6  ;;  %v205_v23 = vmul.f32 10.0, %v201_v18  ;;  %v206_v32 = vmul.f32 10.0, %v202_v29  ;;  %v332_v35 = vmul.f32 0.85, %v201_v18  ;;  %v333_v45 = vmul.f32 0.85, %v202_v29 }
   0xd   :  { %v438_v56 = vmul.f32 6.6666665, %v1240_v50  ;;  %v540_v10 = vmul.f32 6.6666665, %v1243_v63  ;;  %v1244_v18 = vunpack.c.h.bf16 %v1263_v62  ;;  %v1570_v62 = vld [vmem:[%s2055_s5 + $0x68] sm:$0xff] }
   0xe   :  { %81 = vmatpush.msra.mxu0 %v1382_v8  ;;  %237 = vmatpush.msra.mxu2 %v1382_v8  ;;  %v207_v27 = vadd.f32 %v205_v23, %v203_v22  ;;  %v208_v34 = vadd.f32 %v206_v32, %v204_v31  ;;  %v336_v38 = vadd.f32 %v334_v36, %v332_v35  ;;  %v1248_v32 = vunpack.c.h.bf16 %v1264_v13 }
   0xf   :  { %v337_v49 = vadd.f32 %v335_v46, %v333_v45 }
  0x10   :  { %82 = vmatpush.msra.mxu0 %v1389_v9  ;;  %238 = vmatpush.msra.mxu2 %v1389_v9  ;;  %v338_v41 = vmul.f32 0.9, %v207_v27  ;;  %v340_v42 = vmul.f32 10.0, %v336_v38  ;;  %v435_v43 = vmul.f32 0.85, %v336_v38 }
  0x11   :  { %v339_v52 = vmul.f32 0.9, %v208_v34  ;;  %v341_v54 = vmul.f32 10.0, %v337_v49  ;;  %v436_v55 = vmul.f32 0.85, %v337_v49  ;;  %v1266_v49 = vld [vmem:[%s2053_s0 + $0x30] sm:$0xff]  }
  0x12   :  { %83 = vmatpush.msra.mxu0 %v1396_v11  ;;  %239 = vmatpush.msra.mxu2 %v1396_v11  ;;  %v342_v47 = vadd.f32 %v340_v42, %v338_v41  ;;  %v439_v48 = vadd.f32 %v437_v44, %v435_v43  ;;  %v644_v38 = vmul.f32 6.6666665, %v1248_v32  ;;  %v1265_v44 = vld [vmem:[%s2053_s0 + $0x28] sm:$0xff]  }
  0x13   :  { %v343_v58 = vadd.f32 %v341_v54, %v339_v52  ;;  %v440_v59 = vadd.f32 %v438_v56, %v436_v55  ;;  %v1251_v45 = vunpack.c.l.bf16 %v1265_v44  ;;  %v1252_v52 = vunpack.c.h.bf16 %v1265_v44  ;;  %v1552_v56 = vld [vmem:[%s2055_s5 + $0x78] sm:$0xff] }
  0x14   :  { %84 = vmatpush.msra.mxu0 %v1403_v12  ;;  %240 = vmatpush.msra.mxu2 %v1403_v12  ;;  %v441_v51 = vmul.f32 0.9, %v342_v47  ;;  %v443_v53 = vmul.f32 10.0, %v439_v48  ;;  %v538_v7 = vmul.f32 0.85, %v439_v48 }
  0x15   :  { %v442_v60 = vmul.f32 0.9, %v343_v58  ;;  %v444_v61 = vmul.f32 10.0, %v440_v59  ;;  %v746_v48 = vmul.f32 6.6666665, %v1251_v45  ;;  %130 = vmatpush.msra.mxu1 %v1552_v56  ;;  %296 = vmatpush.msra.mxu3 %v1552_v56 }
  0x16   :  { %85 = vmatpush.msra.mxu0 %v1410_v15  ;;  %241 = vmatpush.msra.mxu2 %v1410_v15  ;;  %v445_v57 = vadd.f32 %v443_v53, %v441_v51  ;;  %v542_v14 = vadd.f32 %v540_v10, %v538_v7  ;;  %v1255_v51 = vunpack.c.l.bf16 %v1266_v49  ;;  %v1256_v7 = vunpack.c.h.bf16 %v1266_v49  ;;  %v1581_v10 = vld [vmem:[%s2055_s5 + $0x60] sm:$0xff] }
  0x17   :  { %v446_v5 = vadd.f32 %v444_v61, %v442_v60  ;;  %v1561_v60 = vld [vmem:[%s2055_s5 + $0x70] sm:$0xff] }
  0x18   :  { %86 = vmatpush.msra.mxu0 %v1417_v16  ;;  %242 = vmatpush.msra.mxu2 %v1417_v16  ;;  %v544_v19 = vmul.f32 0.9, %v445_v57  ;;  %v546_v22 = vmul.f32 10.0, %v542_v14  ;;  %v641_v23 = vmul.f32 0.85, %v542_v14 }
  0x19   :  { %131 = vmatpush.msra.mxu1 %v1561_v60  ;;  %297 = vmatpush.msra.mxu3 %v1561_v60 }
  0x1a   :  { %87 = vmatpush.msra.mxu0 %v1424_v20  ;;  %243 = vmatpush.msra.mxu2 %v1424_v20  ;;  %v548_v29 = vadd.f32 %v546_v22, %v544_v19 }
  0x1b   :  { %132 = vmatpush.msra.mxu1 %v1570_v62  ;;  %298 = vmatpush.msra.mxu3 %v1570_v62 }
  0x1c   :  { %88 = vmatpush.msra.mxu0 %v1431_v21  ;;  %244 = vmatpush.msra.mxu2 %v1431_v21  ;;  %v647_v33 = vmul.f32 0.9, %v548_v29 }
  0x1d   :  { %133 = vmatpush.msra.mxu1 %v1581_v10  ;;  %299 = vmatpush.msra.mxu3 %v1581_v10 }
  0x1e   :  { %89 = vmatpush.msra.mxu0 %v1438_v25  ;;  %245 = vmatpush.msra.mxu2 %v1438_v25 }
  0x20   :  { %90 = vmatpush.msra.mxu0 %v1445_v26  ;;  %246 = vmatpush.msra.mxu2 %v1445_v26 }
  0x21   :  { %91 = vmatmul.f32.vlgmr.msra.gmra.mxu0 %v55_v17  ;;  %247 = vmatmul.f32.vlgmr.msra.gmra.mxu2 %v207_v27  ;;  %v1247_v17 = vunpack.c.l.bf16 %v1264_v13  ;;  %v539_v27 = vmul.f32 0.85, %v440_v59  ;;  %v747_v59 = vmul.f32 6.6666665, %v1252_v52 }
  0x22   :  { %350 = vmatpush.msrb.mxu0 %v1339_v0  ;;  %453 = vmatpush.msrb.mxu2 %v1339_v0 }
  0x23   :  { %v643_v24 = vmul.f32 6.6666665, %v1247_v17  ;;  %v1590_v17 = vld [vmem:[%s2055_s5 + $0x58] sm:$0xff] }
  0x24   :  { %351 = vmatpush.msrb.mxu0 %v1344_v1  ;;  %454 = vmatpush.msrb.mxu2 %v1344_v1 }
  0x25   :  { %v645_v30 = vadd.f32 %v643_v24, %v641_v23  ;;  %v850_v23 = vmul.f32 6.6666665, %v1256_v7  ;;  %134 = vmatpush.msra.mxu1 %v1590_v17  ;;  %300 = vmatpush.msra.mxu3 %v1590_v17  ;;  %v1600_v24 = vld [vmem:[%s2055_s5 + $0x50] sm:$0xff] }
  0x26   :  { %352 = vmatpush.msrb.mxu0 %v1351_v2  ;;  %455 = vmatpush.msrb.mxu2 %v1351_v2 }
  0x27   :  { %v649_v35 = vmul.f32 10.0, %v645_v30  ;;  %135 = vmatpush.msra.mxu1 %v1600_v24  ;;  %301 = vmatpush.msra.mxu3 %v1600_v24 }
  0x28   :  { %353 = vmatpush.msrb.mxu0 %v1358_v3  ;;  %456 = vmatpush.msrb.mxu2 %v1358_v3 }
  0x29   :  { %94 = vmatmul.f32.gmra.mxu0 %v56_v28  ;;  %250 = vmatmul.f32.gmra.mxu2 %v208_v34  ;;  %v541_v28 = vmul.f32 6.6666665, %v1244_v18  ;;  %v545_v34 = vmul.f32 0.9, %v446_v5  ;;  %v651_v39 = vadd.f32 %v649_v35, %v647_v33  ;;  %v1638_v35 = vld [vmem:[%s2055_s5 + $0x30] sm:$0xff] }
  0x2a   :  { %354 = vmatpush.msrb.mxu0 %v1365_v4  ;;  %457 = vmatpush.msrb.mxu2 %v1365_v4 }
  0x2b   :  { %v543_v31 = vadd.f32 %v541_v28, %v539_v27  ;;  %v750_v53 = vmul.f32 0.9, %v651_v39  ;;  %v1609_v27 = vld [vmem:[%s2055_s5 + $0x48] sm:$0xff] }
  0x2c   :  { %355 = vmatpush.msrb.mxu0 %v1375_v6  ;;  %458 = vmatpush.msrb.mxu2 %v1375_v6 }
  0x2d   :  { %v547_v36 = vmul.f32 10.0, %v543_v31  ;;  %v642_v37 = vmul.f32 0.85, %v543_v31  ;;  %136 = vmatpush.msra.mxu1 %v1609_v27  ;;  %302 = vmatpush.msra.mxu3 %v1609_v27  ;;  %v1622_v31 = vld [vmem:[%s2055_s5 + $0x40] sm:$0xff] }
  0x2e   :  { %356 = vmatpush.msrb.mxu0 %v1382_v8  ;;  %459 = vmatpush.msrb.mxu2 %v1382_v8 }
  0x2f   :  { %v549_v40 = vadd.f32 %v547_v36, %v545_v34  ;;  %v646_v41 = vadd.f32 %v644_v38, %v642_v37  ;;  %137 = vmatpush.msra.mxu1 %v1622_v31  ;;  %303 = vmatpush.msra.mxu3 %v1622_v31  ;;  %v1633_v34 = vld [vmem:[%s2055_s5 + $0x38] sm:$0xff]  ;;  %v1645_v36 = vld [vmem:[%s2055_s5 + $0x28] sm:$0xff]  ;;  %v1655_v38 = vld [vmem:[%s2055_s5 + $0x20] sm:$0xff] }
  0x30   :  { %357 = vmatpush.msrb.mxu0 %v1389_v9  ;;  %460 = vmatpush.msrb.mxu2 %v1389_v9 }
  0x31   :  { %v648_v42 = vmul.f32 0.9, %v549_v40  ;;  %v650_v43 = vmul.f32 10.0, %v646_v41  ;;  %138 = vmatpush.msra.mxu1 %v1633_v34  ;;  %304 = vmatpush.msra.mxu3 %v1633_v34 }
  0x32   :  { %358 = vmatpush.msrb.mxu0 %v1396_v11  ;;  %461 = vmatpush.msrb.mxu2 %v1396_v11 }
  0x33   :  { %v652_v46 = vadd.f32 %v650_v43, %v648_v42  ;;  %139 = vmatpush.msra.mxu1 %v1638_v35  ;;  %305 = vmatpush.msra.mxu3 %v1638_v35  ;;  %v1723_v43 = vld [vmem:[%s2054_s2] ss:$0 sm:$0xff] }
  0x34   :  { %359 = vmatpush.msrb.mxu0 %v1403_v12  ;;  %462 = vmatpush.msrb.mxu2 %v1403_v12 }
  0x35   :  { %v751_v14 = vmul.f32 0.9, %v652_v46  ;;  %140 = vmatpush.msra.mxu1 %v1645_v36  ;;  %306 = vmatpush.msra.mxu3 %v1645_v36 }
  0x36   :  { %360 = vmatpush.msrb.mxu0 %v1410_v15  ;;  %463 = vmatpush.msrb.mxu2 %v1410_v15 }
  0x37   :  { %141 = vmatpush.msra.mxu1 %v1655_v38  ;;  %307 = vmatpush.msra.mxu3 %v1655_v38 }
  0x38   :  { %361 = vmatpush.msrb.mxu0 %v1417_v16  ;;  %464 = vmatpush.msrb.mxu2 %v1417_v16 }
  0x3a   :  { %362 = vmatpush.msrb.mxu0 %v1424_v20  ;;  %465 = vmatpush.msrb.mxu2 %v1424_v20 }
  0x3c   :  { %363 = vmatpush.msrb.mxu0 %v1431_v21  ;;  %466 = vmatpush.msrb.mxu2 %v1431_v21 }
  0x3e   :  { %364 = vmatpush.msrb.mxu0 %v1438_v25  ;;  %467 = vmatpush.msrb.mxu2 %v1438_v25 }
  0x40   :  { %365 = vmatpush.msrb.mxu0 %v1445_v26  ;;  %468 = vmatpush.msrb.mxu2 %v1445_v26 }
  0x41   :  { %366 = vmatmul.f32.vlgmr.msrb.gmra.mxu0 %v342_v47  ;;  %469 = vmatmul.f32.vlgmr.msrb.gmra.mxu2 %v445_v57  ;;  %v744_v47 = vmul.f32 0.85, %v645_v30  ;;  %v849_v57 = vmul.f32 6.6666665, %v1255_v51 }
  0x42   :  { %556 = vmatpush.msra.mxu0 %v1339_v0  ;;  %659 = vmatpush.msra.mxu2 %v1339_v0 }
  0x43   :  { %v748_v50 = vadd.f32 %v746_v48, %v744_v47 }
  0x44   :  { %557 = vmatpush.msra.mxu0 %v1344_v1  ;;  %660 = vmatpush.msra.mxu2 %v1344_v1 }
  0x45   :  { %v752_v54 = vmul.f32 10.0, %v748_v50  ;;  %v847_v55 = vmul.f32 0.85, %v748_v50 }
  0x46   :  { %558 = vmatpush.msra.mxu0 %v1351_v2  ;;  %661 = vmatpush.msra.mxu2 %v1351_v2 }
  0x47   :  { %v754_v61 = vadd.f32 %v752_v54, %v750_v53  ;;  %v1572_v63 = vadd.f32 %v849_v57, %v847_v55 }
  0x48   :  { %559 = vmatpush.msra.mxu0 %v1358_v3  ;;  %662 = vmatpush.msra.mxu2 %v1358_v3 }
  0x49   :  { %369 = vmatmul.f32.gmra.mxu0 %v343_v58  ;;  %472 = vmatmul.f32.gmra.mxu2 %v446_v5  ;;  %v745_v58 = vmul.f32 0.85, %v646_v41  ;;  %v853_v13 = vmul.f32 0.9, %v754_v61  ;;  %v855_v18 = vmul.f32 10.0, %v1572_v63 }
  0x4a   :  { %560 = vmatpush.msra.mxu0 %v1365_v4  ;;  %663 = vmatpush.msra.mxu2 %v1365_v4 }
  0x4b   :  { %v749_v5 = vadd.f32 %v747_v59, %v745_v58  ;;  %v1611_v28 = vadd.f32 %v855_v18, %v853_v13 }
  0x4c   :  { %561 = vmatpush.msra.mxu0 %v1375_v6  ;;  %664 = vmatpush.msra.mxu2 %v1375_v6 }
  0x4d   :  { %v753_v19 = vmul.f32 10.0, %v749_v5  ;;  %v848_v22 = vmul.f32 0.85, %v749_v5 }
  0x4e   :  { %562 = vmatpush.msra.mxu0 %v1382_v8  ;;  %665 = vmatpush.msra.mxu2 %v1382_v8 }
  0x4f   :  { %v1613_v30 = vadd.f32 %v850_v23, %v848_v22 }
  0x50   :  { %563 = vmatpush.msra.mxu0 %v1389_v9  ;;  %666 = vmatpush.msra.mxu2 %v1389_v9 }
  0x51   :  { %v856_v33 = vmul.f32 10.0, %v1613_v30 }
  0x52   :  { %564 = vmatpush.msra.mxu0 %v1396_v11  ;;  %667 = vmatpush.msra.mxu2 %v1396_v11 }
  0x54   :  { %565 = vmatpush.msra.mxu0 %v1403_v12  ;;  %668 = vmatpush.msra.mxu2 %v1403_v12 }
  0x56   :  { %566 = vmatpush.msra.mxu0 %v1410_v15  ;;  %669 = vmatpush.msra.mxu2 %v1410_v15 }
  0x58   :  { %567 = vmatpush.msra.mxu0 %v1417_v16  ;;  %670 = vmatpush.msra.mxu2 %v1417_v16 }
  0x5a   :  { %568 = vmatpush.msra.mxu0 %v1424_v20  ;;  %671 = vmatpush.msra.mxu2 %v1424_v20 }
  0x5c   :  { %569 = vmatpush.msra.mxu0 %v1431_v21  ;;  %672 = vmatpush.msra.mxu2 %v1431_v21 }
  0x5e   :  { %570 = vmatpush.msra.mxu0 %v1438_v25  ;;  %673 = vmatpush.msra.mxu2 %v1438_v25 }
  0x60   :  { %571 = vmatpush.msra.mxu0 %v1445_v26  ;;  %674 = vmatpush.msra.mxu2 %v1445_v26 }
  0x61   :  { %572 = vmatmul.f32.vlgmr.msra.gmra.mxu0 %v548_v29  ;;  %675 = vmatmul.f32.vlgmr.msra.gmra.mxu2 %v651_v39  ;;  %v755_v29 = vadd.f32 %v753_v19, %v751_v14 }
  0x62   :  { %762 = vmatpush.msrb.mxu0 %v1339_v0  ;;  %865 = vmatpush.msrb.mxu2 %v1339_v0 }
  0x63   :  { %v854_v32 = vmul.f32 0.9, %v755_v29 }
  0x64   :  { %763 = vmatpush.msrb.mxu0 %v1344_v1  ;;  %866 = vmatpush.msrb.mxu2 %v1344_v1 }
  0x65   :  { %v1650_v37 = vadd.f32 %v856_v33, %v854_v32 }
  0x66   :  { %764 = vmatpush.msrb.mxu0 %v1351_v2  ;;  %867 = vmatpush.msrb.mxu2 %v1351_v2 }
  0x68   :  { %765 = vmatpush.msrb.mxu0 %v1358_v3  ;;  %868 = vmatpush.msrb.mxu2 %v1358_v3 }
  0x69   :  { %575 = vmatmul.f32.gmra.mxu0 %v549_v40  ;;  %678 = vmatmul.f32.gmra.mxu2 %v652_v46 }
  0x6a   :  { %766 = vmatpush.msrb.mxu0 %v1365_v4  ;;  %869 = vmatpush.msrb.mxu2 %v1365_v4 }
  0x6c   :  { %767 = vmatpush.msrb.mxu0 %v1375_v6  ;;  %870 = vmatpush.msrb.mxu2 %v1375_v6 }
  0x6e   :  { %768 = vmatpush.msrb.mxu0 %v1382_v8  ;;  %871 = vmatpush.msrb.mxu2 %v1382_v8 }
  0x70   :  { %769 = vmatpush.msrb.mxu0 %v1389_v9  ;;  %872 = vmatpush.msrb.mxu2 %v1389_v9 }
  0x72   :  { %770 = vmatpush.msrb.mxu0 %v1396_v11  ;;  %873 = vmatpush.msrb.mxu2 %v1396_v11 }
  0x74   :  { %771 = vmatpush.msrb.mxu0 %v1403_v12  ;;  %874 = vmatpush.msrb.mxu2 %v1403_v12 }
  0x76   :  { %772 = vmatpush.msrb.mxu0 %v1410_v15  ;;  %875 = vmatpush.msrb.mxu2 %v1410_v15 }
  0x78   :  { %773 = vmatpush.msrb.mxu0 %v1417_v16  ;;  %876 = vmatpush.msrb.mxu2 %v1417_v16 }
  0x7a   :  { %774 = vmatpush.msrb.mxu0 %v1424_v20  ;;  %877 = vmatpush.msrb.mxu2 %v1424_v20 }
  0x7c   :  { %775 = vmatpush.msrb.mxu0 %v1431_v21  ;;  %878 = vmatpush.msrb.mxu2 %v1431_v21 }
  0x7e   :  { %776 = vmatpush.msrb.mxu0 %v1438_v25  ;;  %879 = vmatpush.msrb.mxu2 %v1438_v25 }
  0x80   :  { %777 = vmatpush.msrb.mxu0 %v1445_v26  ;;  %880 = vmatpush.msrb.mxu2 %v1445_v26 }
  0x81   :  { %778 = vmatmul.f32.vlgmr.msrb.gmra.mxu0 %v754_v61  ;;  %881 = vmatmul.f32.vlgmr.msrb.gmra.mxu2 %v1611_v28 }
  0x82   :  { %968 = vmatpush.msra.mxu0 %v1339_v0  ;;  %v1667_v0 = vld [vmem:[%s2055_s5 + $0x18] sm:$0xff] }
  0x83   :  { %142 = vmatpush.msra.mxu1 %v1667_v0  ;;  %308 = vmatpush.msra.mxu3 %v1667_v0 }
  0x84   :  { %969 = vmatpush.msra.mxu0 %v1344_v1  ;;  %v1672_v1 = vld [vmem:[%s2055_s5 + $0x10] sm:$0xff] }
  0x85   :  { %143 = vmatpush.msra.mxu1 %v1672_v1  ;;  %309 = vmatpush.msra.mxu3 %v1672_v1 }
  0x86   :  { %970 = vmatpush.msra.mxu0 %v1351_v2  ;;  %v1267_v2 = vld [vmem:[%s2053_s0 + $0x38] sm:$0xff]  }
  0x87   :  { %v1259_v39 = vunpack.c.l.bf16 %v1267_v2 }
  0x88   :  { %971 = vmatpush.msra.mxu0 %v1358_v3  ;;  %v1682_v3 = vld [vmem:[%s2055_s5 + $0x8] sm:$0xff] }
  0x89   :  { %781 = vmatmul.f32.gmra.mxu0 %v755_v29  ;;  %884 = vmatmul.f32.gmra.mxu2 %v1650_v37  ;;  %v952_v40 = vmul.f32 6.6666665, %v1259_v39 }
  0x8a   :  { %972 = vmatpush.msra.mxu0 %v1365_v4  ;;  %v1690_v4 = vld [vmem:[%s2055_s5] sm:$0xff]  ;;  %144 = vmatpush.msra.mxu1 %v1682_v3 }
  0x8b   :  { %310 = vmatpush.msra.mxu3 %v1682_v3 }
  0x8c   :  { %973 = vmatpush.msra.mxu0 %v1375_v6  ;;  %145 = vmatpush.msra.mxu1 %v1690_v4  ;;  %v950_v6 = vmul.f32 0.85, %v1572_v63 }
  0x8d   :  { %311 = vmatpush.msra.mxu3 %v1690_v4 }
  0x8e   :  { %974 = vmatpush.msra.mxu0 %v1382_v8  ;;  %399 = vmatpush.msrb.mxu1 %v1552_v56  ;;  %v954_v8 = vadd.f32 %v952_v40, %v950_v6 }
  0x8f   :  { %502 = vmatpush.msrb.mxu3 %v1552_v56 }
  0x90   :  { %975 = vmatpush.msra.mxu0 %v1389_v9  ;;  %400 = vmatpush.msrb.mxu1 %v1561_v60  ;;  %v1260_v9 = vunpack.c.h.bf16 %v1267_v2  ;;  %v958_v41 = vmul.f32 10.0, %v954_v8 }
  0x91   :  { %503 = vmatpush.msrb.mxu3 %v1561_v60 }
  0x92   :  { %976 = vmatpush.msra.mxu0 %v1396_v11  ;;  %401 = vmatpush.msrb.mxu1 %v1570_v62  ;;  %v956_v11 = vmul.f32 0.9, %v1611_v28  ;;  %v953_v42 = vmul.f32 6.6666665, %v1260_v9 }
  0x93   :  { %504 = vmatpush.msrb.mxu3 %v1570_v62 }
  0x94   :  { %977 = vmatpush.msra.mxu0 %v1403_v12  ;;  %402 = vmatpush.msrb.mxu1 %v1581_v10  ;;  %v951_v12 = vmul.f32 0.85, %v1613_v30 }
  0x95   :  { %505 = vmatpush.msrb.mxu3 %v1581_v10 }
  0x96   :  { %978 = vmatpush.msra.mxu0 %v1410_v15  ;;  %403 = vmatpush.msrb.mxu1 %v1590_v17  ;;  %v960_v15 = vadd.f32 %v958_v41, %v956_v11 }
  0x97   :  { %506 = vmatpush.msrb.mxu3 %v1590_v17 }
  0x98   :  { %979 = vmatpush.msra.mxu0 %v1417_v16  ;;  %404 = vmatpush.msrb.mxu1 %v1600_v24  ;;  %v955_v16 = vadd.f32 %v953_v42, %v951_v12 }
  0x99   :  { %507 = vmatpush.msrb.mxu3 %v1600_v24 }
  0x9a   :  { %980 = vmatpush.msra.mxu0 %v1424_v20  ;;  %405 = vmatpush.msrb.mxu1 %v1609_v27  ;;  %v959_v44 = vmul.f32 10.0, %v955_v16 }
  0x9b   :  { %508 = vmatpush.msrb.mxu3 %v1609_v27 }
  0x9c   :  { %981 = vmatpush.msra.mxu0 %v1431_v21  ;;  %406 = vmatpush.msrb.mxu1 %v1622_v31  ;;  %v957_v21 = vmul.f32 0.9, %v1650_v37 }
  0x9d   :  { %509 = vmatpush.msrb.mxu3 %v1622_v31 }
  0x9e   :  { %982 = vmatpush.msra.mxu0 %v1438_v25  ;;  %v92_v20 = vpop.f32.mrf.mxu0  ;;  %407 = vmatpush.msrb.mxu1 %v1633_v34  ;;  %v1274_v25 = vmov 0.0  }
  0x9f   :  { %v93_v45 = vadd.f32 %v1723_v43, %v92_v20  ;;  %510 = vmatpush.msrb.mxu3 %v1633_v34 }
  0xa0   :  { %983 = vmatpush.msra.mxu0 %v1445_v26  ;;  %408 = vmatpush.msrb.mxu1 %v1638_v35  ;;  %v961_v26 = vadd.f32 %v959_v44, %v957_v21 }
  0xa1   :  { %984 = vmatmul.f32.vlgmr.msra.gmra.mxu0 %v960_v15  ;;  %vm100_vm0 = vcmp.ge.f32.partialorder %v93_v45, 0.0  ;;  %511 = vmatpush.msrb.mxu3 %v1638_v35 }
  0xa2   :  { %v1171_v46 = vsel %vm100_vm0, 1.0, %v1274_v25  ;;  %409 = vmatpush.msrb.mxu1 %v1645_v36 }
  0xa3   :  { %v106_v47 = vmul.f32 6.6666665, %v1171_v46  ;;  %v211_v48 = vmul.f32 0.35, %v1171_v46  ;;  %512 = vmatpush.msrb.mxu3 %v1645_v36 }
  0xa4   :  { %v248_v49 = vpop.f32.mrf.mxu2  ;;  %410 = vmatpush.msrb.mxu1 %v1655_v38 }
  0xa5   :  { %v213_v50 = vsub.f32 0.0, %v211_v48  ;;  %v249_v51 = vadd.f32 %v1723_v43, %v248_v49  ;;  %v110_v52 = vmul.f32 10.0, %v106_v47  ;;  %513 = vmatpush.msrb.mxu3 %v1655_v38  ;;  %v262_v57 = vmul.f32 0.85, %v106_v47 }
  0xa6   :  { %v95_v53 = vpop.f32.mrf.mxu0  ;;  %411 = vmatpush.msrb.mxu1 %v1667_v0 }
  0xa7   :  { %v254_v54 = vadd.f32 %v249_v51, %v213_v50  ;;  %v96_v55 = vadd.f32 %v1723_v43, %v95_v53  ;;  %146 = vmatmul.f32.vlgmr.msra.gmra.mxu1 %v110_v52  ;;  %514 = vmatpush.msrb.mxu3 %v1667_v0  ;;  %v268_v18 = vmul.f32 0.9, %v110_v52  ;;  %v344_v39 = vmul.f32 0.65, %v213_v50 }
  0xa8   :  { %412 = vmatpush.msrb.mxu1 %v1672_v1 }
  0xa9   :  { %987 = vmatmul.f32.gmra.mxu0 %v961_v26  ;;  %vm256_vm1 = vcmp.ge.f32.partialorder %v254_v54, 0.0  ;;  %vm101_vm2 = vcmp.ge.f32.partialorder %v96_v55, 0.0  ;;  %515 = vmatpush.msrb.mxu3 %v1672_v1 }
  0xaa   :  { %v1175_v58 = vsel %vm256_vm1, 1.0, %v1274_v25  ;;  %v1172_v59 = vsel %vm101_vm2, 1.0, %v1274_v25  ;;  %413 = vmatpush.msrb.mxu1 %v1682_v3 }
  0xab   :  { %v264_v61 = vmul.f32 6.6666665, %v1175_v58  ;;  %v107_v63 = vmul.f32 6.6666665, %v1172_v59  ;;  %v212_v5 = vmul.f32 0.35, %v1172_v59  ;;  %516 = vmatpush.msrb.mxu3 %v1682_v3 }
  0xac   :  { %v251_v7 = vpop.f32.mrf.mxu2  ;;  %414 = vmatpush.msrb.mxu1 %v1690_v4  ;;  %v346_v6 = vmul.f32 0.35, %v1175_v58 }
  0xad   :  { %v252_v13 = vadd.f32 %v1723_v43, %v251_v7  ;;  %v266_v14 = vadd.f32 %v264_v61, %v262_v57  ;;  %v214_v19 = vsub.f32 0.0, %v212_v5  ;;  %v111_v22 = vmul.f32 10.0, %v107_v63  ;;  %517 = vmatpush.msrb.mxu3 %v1690_v4 }
  0xae   :  { %605 = vmatpush.msra.mxu1 %v1552_v56  ;;  %v263_v30 = vmul.f32 0.85, %v107_v63  ;;  %v348_v9 = vsub.f32 %v344_v39, %v346_v6 }
  0xaf   :  { %v270_v23 = vmul.f32 10.0, %v266_v14  ;;  %v255_v28 = vadd.f32 %v252_v13, %v214_v19  ;;  %149 = vmatmul.f32.gmra.mxu1 %v111_v22  ;;  %v269_v2 = vmul.f32 0.9, %v111_v22  ;;  %v345_v12 = vmul.f32 0.65, %v214_v19 }
  0xb0   :  { %606 = vmatpush.msra.mxu1 %v1561_v60  ;;  %v381_v16 = vmul.f32 0.85, %v266_v14  ;;  %v447_v20 = vmul.f32 0.65, %v348_v9 }
  0xb1   :  { %v272_v29 = vadd.f32 %v270_v23, %v268_v18  ;;  %vm257_vm3 = vcmp.ge.f32.partialorder %v255_v28, 0.0 }
  0xb2   :  { %v1176_v32 = vsel %vm257_vm3, 1.0, %v1274_v25  ;;  %607 = vmatpush.msra.mxu1 %v1570_v62 }
  0xb3   :  { %312 = vmatmul.f32.vlgmr.msra.gmra.mxu3 %v272_v29  ;;  %v265_v33 = vmul.f32 6.6666665, %v1176_v32  ;;  %v347_v42 = vmul.f32 0.35, %v1176_v32  ;;  %v387_v50 = vmul.f32 0.9, %v272_v29 }
  0xb4   :  { %708 = vmatpush.msra.mxu3 %v1552_v56  ;;  %608 = vmatpush.msra.mxu1 %v1581_v10 }
  0xb5   :  { %v267_v37 = vadd.f32 %v265_v33, %v263_v30  ;;  %v349_v47 = vsub.f32 %v345_v12, %v347_v42 }
  0xb6   :  { %709 = vmatpush.msra.mxu3 %v1561_v60  ;;  %609 = vmatpush.msra.mxu1 %v1590_v17 }
  0xb7   :  { %v271_v40 = vmul.f32 10.0, %v267_v37  ;;  %v382_v57 = vmul.f32 0.85, %v267_v37  ;;  %v448_v5 = vmul.f32 0.65, %v349_v47 }
  0xb8   :  { %710 = vmatpush.msra.mxu3 %v1570_v62  ;;  %610 = vmatpush.msra.mxu1 %v1600_v24 }
  0xb9   :  { %v273_v8 = vadd.f32 %v271_v40, %v269_v2 }
  0xba   :  { %711 = vmatpush.msra.mxu3 %v1581_v10  ;;  %611 = vmatpush.msra.mxu1 %v1609_v27 }
  0xbb   :  { %315 = vmatmul.f32.gmra.mxu3 %v273_v8  ;;  %v388_v28 = vmul.f32 0.9, %v273_v8 }
  0xbc   :  { %612 = vmatpush.msra.mxu1 %v1622_v31  ;;  %712 = vmatpush.msra.mxu3 %v1590_v17 }
  0xbe   :  { %v367_v11 = vpop.f32.mrf.mxu0  ;;  %613 = vmatpush.msra.mxu1 %v1633_v34  ;;  %713 = vmatpush.msra.mxu3 %v1600_v24 }
  0xbf   :  { %v368_v41 = vadd.f32 %v1723_v43, %v367_v11 }
  0xc0   :  { %614 = vmatpush.msra.mxu1 %v1638_v35  ;;  %714 = vmatpush.msra.mxu3 %v1609_v27 }
  0xc1   :  { %v373_v15 = vadd.f32 %v368_v41, %v348_v9 }
  0xc2   :  { %615 = vmatpush.msra.mxu1 %v1645_v36  ;;  %715 = vmatpush.msra.mxu3 %v1622_v31 }
  0xc3   :  { %vm375_vm4 = vcmp.ge.f32.partialorder %v373_v15, 0.0 }
  0xc4   :  { %v1181_v21 = vsel %vm375_vm4, 1.0, %v1274_v25  ;;  %v470_v44 = vpop.f32.mrf.mxu2  ;;  %616 = vmatpush.msra.mxu1 %v1655_v38  ;;  %716 = vmatpush.msra.mxu3 %v1633_v34 }
  0xc5   :  { %v383_v45 = vmul.f32 6.6666665, %v1181_v21  ;;  %v449_v46 = vmul.f32 0.35, %v1181_v21  ;;  %v471_v26 = vadd.f32 %v1723_v43, %v470_v44 }
  0xc6   :  { %v370_v48 = vpop.f32.mrf.mxu0  ;;  %617 = vmatpush.msra.mxu1 %v1667_v0  ;;  %717 = vmatpush.msra.mxu3 %v1638_v35 }
  0xc7   :  { %v385_v49 = vadd.f32 %v383_v45, %v381_v16  ;;  %v451_v51 = vsub.f32 %v447_v20, %v449_v46  ;;  %v371_v52 = vadd.f32 %v1723_v43, %v370_v48 }
  0xc8   :  { %618 = vmatpush.msra.mxu1 %v1672_v1  ;;  %718 = vmatpush.msra.mxu3 %v1645_v36 }
  0xc9   :  { %v476_v53 = vadd.f32 %v471_v26, %v451_v51  ;;  %v374_v54 = vadd.f32 %v371_v52, %v349_v47  ;;  %v389_v55 = vmul.f32 10.0, %v385_v49  ;;  %v484_v58 = vmul.f32 0.85, %v385_v49 }
  0xca   :  { %719 = vmatpush.msra.mxu3 %v1655_v38  ;;  %619 = vmatpush.msra.mxu1 %v1682_v3  ;;  %v550_v42 = vmul.f32 0.65, %v451_v51 }
  0xcb   :  { %vm478_vm5 = vcmp.ge.f32.partialorder %v476_v53, 0.0  ;;  %vm376_vm6 = vcmp.ge.f32.partialorder %v374_v54, 0.0  ;;  %v391_v59 = vadd.f32 %v389_v55, %v387_v50  ;;  %v1068_v50 = vld [vmem:[%s2057_s3 + $0x78] sm:$0xff] }
  0xcc   :  { %v1187_v61 = vsel %vm478_vm5, 1.0, %v1274_v25  ;;  %v1182_v63 = vsel %vm376_vm6, 1.0, %v1274_v25  ;;  %v473_v7 = vpop.f32.mrf.mxu2  ;;  %720 = vmatpush.msra.mxu3 %v1667_v0  ;;  %620 = vmatpush.msra.mxu1 %v1690_v4 }
  0xcd   :  { %v486_v13 = vmul.f32 6.6666665, %v1187_v61  ;;  %v384_v14 = vmul.f32 6.6666665, %v1182_v63  ;;  %415 = vmatmul.f32.vlgmr.msrb.gmra.mxu1 %v391_v59  ;;  %v450_v18 = vmul.f32 0.35, %v1182_v63  ;;  %v474_v19 = vadd.f32 %v1723_v43, %v473_v7  ;;  %1073 = vmatpush.msra.mxu2 %v1068_v50 }
  0xce   :  { %v490_v30 = vmul.f32 0.9, %v391_v59  ;;  %811 = vmatpush.msrb.mxu1 %v1552_v56  ;;  %721 = vmatpush.msra.mxu3 %v1672_v1  ;;  %v552_v12 = vmul.f32 0.35, %v1187_v61  ;;  %v1066_v63 = vld [vmem:[%s2057_s3 + $0x68] sm:$0xff] }
  0xcf   :  { %v488_v22 = vadd.f32 %v486_v13, %v484_v58  ;;  %v386_v23 = vadd.f32 %v384_v14, %v382_v57  ;;  %v452_v29 = vsub.f32 %v448_v5, %v450_v18  ;;  %v1067_v57 = vld [vmem:[%s2057_s3 + $0x70] sm:$0xff] }
  0xd0   :  { %812 = vmatpush.msrb.mxu1 %v1561_v60  ;;  %722 = vmatpush.msra.mxu3 %v1682_v3  ;;  %v554_v20 = vsub.f32 %v550_v42, %v552_v12  ;;  %v1062_v12 = vld [vmem:[%s2057_s3 + $0x48] sm:$0xff] }
  0xd1   :  { %v492_v32 = vmul.f32 10.0, %v488_v22  ;;  %v390_v33 = vmul.f32 10.0, %v386_v23  ;;  %v477_v37 = vadd.f32 %v474_v19, %v452_v29  ;;  %v485_v6 = vmul.f32 0.85, %v386_v23  ;;  %1074 = vmatpush.msra.mxu2 %v1067_v57  ;;  %v1065_v19 = vld [vmem:[%s2057_s3 + $0x60] sm:$0xff] }
  0xd2   :  { %813 = vmatpush.msrb.mxu1 %v1570_v62  ;;  %723 = vmatpush.msra.mxu3 %v1690_v4  ;;  %v551_v46 = vmul.f32 0.65, %v452_v29  ;;  %v587_v47 = vmul.f32 0.85, %v488_v22  ;;  %v653_v48 = vmul.f32 0.65, %v554_v20 }
  0xd3   :  { %v494_v2 = vadd.f32 %v492_v32, %v490_v30  ;;  %v392_v39 = vadd.f32 %v390_v33, %v388_v28  ;;  %vm479_vm7 = vcmp.ge.f32.partialorder %v477_v37, 0.0  ;;  %1075 = vmatpush.msra.mxu2 %v1066_v63  ;;  %v1064_v33 = vld [vmem:[%s2057_s3 + $0x58] sm:$0xff] }
  0xd4   :  { %v1188_v40 = vsel %vm479_vm7, 1.0, %v1274_v25  ;;  %814 = vmatpush.msrb.mxu1 %v1581_v10 }
  0xd5   :  { %518 = vmatmul.f32.vlgmr.msrb.gmra.mxu3 %v494_v2  ;;  %418 = vmatmul.f32.gmra.mxu1 %v392_v39  ;;  %v487_v8 = vmul.f32 6.6666665, %v1188_v40  ;;  %v491_v11 = vmul.f32 0.9, %v392_v39  ;;  %v553_v44 = vmul.f32 0.35, %v1188_v40 }
  0xd6   :  { %914 = vmatpush.msrb.mxu3 %v1552_v56  ;;  %815 = vmatpush.msrb.mxu1 %v1590_v17  ;;  %v593_v5 = vmul.f32 0.9, %v494_v2  ;;  %v1063_v40 = vld [vmem:[%s2057_s3 + $0x50] sm:$0xff] }
  0xd7   :  { %v489_v9 = vadd.f32 %v487_v8, %v485_v6  ;;  %v555_v53 = vsub.f32 %v551_v46, %v553_v44  ;;  %1076 = vmatpush.msra.mxu2 %v1065_v19 }
  0xd8   :  { %915 = vmatpush.msrb.mxu3 %v1561_v60  ;;  %816 = vmatpush.msrb.mxu1 %v1600_v24 }
  0xd9   :  { %v493_v41 = vmul.f32 10.0, %v489_v9  ;;  %v654_v18 = vmul.f32 0.65, %v555_v53  ;;  %v588_v23 = vmul.f32 0.85, %v489_v9  ;;  %1077 = vmatpush.msra.mxu2 %v1064_v33 }
  0xda   :  { %916 = vmatpush.msrb.mxu3 %v1570_v62  ;;  %817 = vmatpush.msrb.mxu1 %v1609_v27 }
  0xdb   :  { %v1805_v15 = vadd.f32 %v493_v41, %v491_v11  ;;  %1078 = vmatpush.msra.mxu2 %v1063_v40 }
  0xdc   :  { %917 = vmatpush.msrb.mxu3 %v1581_v10  ;;  %818 = vmatpush.msrb.mxu1 %v1622_v31 }
  0xdd   :  { %521 = vmatmul.f32.gmra.mxu3 %v1805_v15  ;;  %v594_v41 = vmul.f32 0.9, %v1805_v15  ;;  %1079 = vmatpush.msra.mxu2 %v1062_v12 }
  0xde   :  { %v573_v16 = vpop.f32.mrf.mxu0  ;;  %918 = vmatpush.msrb.mxu3 %v1590_v17  ;;  %819 = vmatpush.msrb.mxu1 %v1633_v34 }
  0xdf   :  { %v574_v21 = vadd.f32 %v1723_v43, %v573_v16 }
  0xe0   :  { %919 = vmatpush.msrb.mxu3 %v1600_v24  ;;  %820 = vmatpush.msrb.mxu1 %v1638_v35 }
  0xe1   :  { %v579_v45 = vadd.f32 %v574_v21, %v554_v20 }
  0xe2   :  { %920 = vmatpush.msrb.mxu3 %v1609_v27  ;;  %821 = vmatpush.msrb.mxu1 %v1645_v36 }
  0xe3   :  { %vm581_vm8 = vcmp.ge.f32.partialorder %v579_v45, 0.0  ;;  %v1061_v45 = vld [vmem:[%s2057_s3 + $0x40] sm:$0xff] }
  0xe4   :  { %v1193_v26 = vsel %vm581_vm8, 1.0, %v1274_v25  ;;  %v676_v49 = vpop.f32.mrf.mxu2  ;;  %921 = vmatpush.msrb.mxu3 %v1622_v31  ;;  %822 = vmatpush.msrb.mxu1 %v1655_v38 }
  0xe5   :  { %v589_v51 = vmul.f32 6.6666665, %v1193_v26  ;;  %v655_v52 = vmul.f32 0.35, %v1193_v26  ;;  %v677_v54 = vadd.f32 %v1723_v43, %v676_v49  ;;  %1080 = vmatpush.msra.mxu2 %v1061_v45  ;;  %v1058_v49 = vld [vmem:[%s2057_s3 + $0x28] sm:$0xff] }
  0xe6   :  { %v576_v55 = vpop.f32.mrf.mxu0  ;;  %922 = vmatpush.msrb.mxu3 %v1633_v34  ;;  %823 = vmatpush.msrb.mxu1 %v1667_v0 }
  0xe7   :  { %v591_v58 = vadd.f32 %v589_v51, %v587_v47  ;;  %v577_v59 = vadd.f32 %v1723_v43, %v576_v55  ;;  %v1829_v61 = vsub.f32 %v653_v48, %v655_v52  ;;  %v1055_v55 = vld [vmem:[%s2057_s3 + $0x10] sm:$0xff] }
  0xe8   :  { %923 = vmatpush.msrb.mxu3 %v1638_v35  ;;  %824 = vmatpush.msrb.mxu1 %v1672_v1 }
  0xe9   :  { %v595_v7 = vmul.f32 10.0, %v591_v58  ;;  %v580_v13 = vadd.f32 %v577_v59, %v555_v53  ;;  %v682_v14 = vadd.f32 %v677_v54, %v1829_v61  ;;  %v690_v30 = vmul.f32 0.85, %v591_v58 }
  0xea   :  { %924 = vmatpush.msrb.mxu3 %v1645_v36  ;;  %825 = vmatpush.msrb.mxu1 %v1682_v3  ;;  %v756_v54 = vmul.f32 0.65, %v1829_v61 }
  0xeb   :  { %vm582_vm9 = vcmp.ge.f32.partialorder %v580_v13, 0.0  ;;  %vm684_vm10 = vcmp.ge.f32.partialorder %v682_v14, 0.0  ;;  %v597_v22 = vadd.f32 %v595_v7, %v593_v5 }
  0xec   :  { %v1194_v28 = vsel %vm582_vm9, 1.0, %v1274_v25  ;;  %v1199_v29 = vsel %vm684_vm10, 1.0, %v1274_v25  ;;  %v679_v32 = vpop.f32.mrf.mxu2  ;;  %925 = vmatpush.msrb.mxu3 %v1655_v38  ;;  %826 = vmatpush.msrb.mxu1 %v1690_v4 }
  0xed   :  { %v590_v37 = vmul.f32 6.6666665, %v1194_v28  ;;  %v656_v2 = vmul.f32 0.35, %v1194_v28  ;;  %v692_v39 = vmul.f32 6.6666665, %v1199_v29  ;;  %621 = vmatmul.f32.vlgmr.msra.gmra.mxu1 %v597_v22  ;;  %v680_v6 = vadd.f32 %v1723_v43, %v679_v32 }
  0xee   :  { %926 = vmatpush.msrb.mxu3 %v1667_v0  ;;  %v696_v21 = vmul.f32 0.9, %v597_v22  ;;  %1017 = vmatpush.msra.mxu1 %v1552_v56  ;;  %v1060_v56 = vld [vmem:[%s2057_s3 + $0x38] sm:$0xff]  ;;  %v758_v52 = vmul.f32 0.35, %v1199_v29 }
  0xef   :  { %v1855_v8 = vadd.f32 %v692_v39, %v690_v30  ;;  %v1857_v9 = vsub.f32 %v654_v18, %v656_v2  ;;  %v592_v11 = vadd.f32 %v590_v37, %v588_v23  ;;  %1081 = vmatpush.msra.mxu2 %v1060_v56 }
  0xf0   :  { %927 = vmatpush.msrb.mxu3 %v1672_v1  ;;  %1018 = vmatpush.msra.mxu1 %v1561_v60  ;;  %v1059_v60 = vld [vmem:[%s2057_s3 + $0x30] sm:$0xff]  ;;  %v760_v57 = vsub.f32 %v756_v54, %v758_v52 }
  0xf1   :  { %v698_v42 = vmul.f32 10.0, %v1855_v8  ;;  %v683_v16 = vadd.f32 %v680_v6, %v1857_v9  ;;  %v596_v20 = vmul.f32 10.0, %v592_v11  ;;  %v691_v47 = vmul.f32 0.85, %v592_v11  ;;  %1082 = vmatpush.msra.mxu2 %v1059_v60 }
  0xf2   :  { %928 = vmatpush.msrb.mxu3 %v1682_v3  ;;  %1019 = vmatpush.msra.mxu1 %v1570_v62  ;;  %v1057_v62 = vld [vmem:[%s2057_s3 + $0x20] sm:$0xff]  ;;  %v793_v5 = vmul.f32 0.85, %v1855_v8  ;;  %v859_v18 = vmul.f32 0.65, %v760_v57 }
  0xf3   :  { %vm685_vm11 = vcmp.ge.f32.partialorder %v683_v16, 0.0  ;;  %v598_v15 = vadd.f32 %v596_v20, %v594_v41  ;;  %v1869_v44 = vadd.f32 %v698_v42, %v696_v21  ;;  %1083 = vmatpush.msra.mxu2 %v1058_v49 }
  0xf4   :  { %v1200_v46 = vsel %vm685_vm11, 1.0, %v1274_v25  ;;  %929 = vmatpush.msrb.mxu3 %v1690_v4  ;;  %1020 = vmatpush.msra.mxu1 %v1581_v10  ;;  %v1056_v10 = vld [vmem:[%s2057_s3 + $0x18] sm:$0xff] }
  0xf5   :  { %v693_v26 = vmul.f32 6.6666665, %v1200_v46  ;;  %624 = vmatmul.f32.gmra.mxu1 %v598_v15  ;;  %724 = vmatmul.f32.vlgmr.msra.gmra.mxu3 %v1869_v44  ;;  %v697_v50 = vmul.f32 0.9, %v598_v15  ;;  %v759_v61 = vmul.f32 0.35, %v1200_v46 }
  0xf6   :  { %1021 = vmatpush.msra.mxu1 %v1590_v17  ;;  %1084 = vmatpush.msra.mxu2 %v1057_v62 }
  0xf7   :  { %v695_v48 = vadd.f32 %v693_v26, %v691_v47 }
  0xf8   :  { %1022 = vmatpush.msra.mxu1 %v1600_v24  ;;  %1085 = vmatpush.msra.mxu2 %v1056_v10  ;;  %v1054_v24 = vld [vmem:[%s2057_s3 + $0x8] sm:$0xff] }
  0xf9   :  { %v699_v51 = vmul.f32 10.0, %v695_v48  ;;  %v794_v8 = vmul.f32 0.85, %v695_v48 }
  0xfa   :  { %1023 = vmatpush.msra.mxu1 %v1609_v27  ;;  %1086 = vmatpush.msra.mxu2 %v1055_v55  ;;  %v1053_v27 = vld [vmem:[%s2057_s3] sm:$0xff] }
  0xfb   :  { %v1894_v53 = vadd.f32 %v699_v51, %v697_v50 }
  0xfc   :  { %1024 = vmatpush.msra.mxu1 %v1622_v31  ;;  %1087 = vmatpush.msra.mxu2 %v1054_v24  ;;  %v757_v31 = vmul.f32 0.65, %v1857_v9 }
  0xfd   :  { %727 = vmatmul.f32.gmra.mxu3 %v1894_v53  ;;  %v800_v16 = vmul.f32 0.9, %v1894_v53 }
  0xfe   :  { %v779_v17 = vpop.f32.mrf.mxu0  ;;  %1025 = vmatpush.msra.mxu1 %v1633_v34  ;;  %1088 = vmatpush.msra.mxu2 %v1053_v27  ;;  %v761_v23 = vsub.f32 %v757_v31, %v759_v61 }
  0xff   :  { %v780_v58 = vadd.f32 %v1723_v43, %v779_v17  ;;  %v1275_v17 = vmov 1.0  }
 0x100   :  { %1026 = vmatpush.msra.mxu1 %v1638_v35  ;;  %v799_v35 = vmul.f32 0.9, %v1869_v44  ;;  %v860_v2 = vmul.f32 0.65, %v761_v23 }
 0x101   :  { %v785_v59 = vadd.f32 %v780_v58, %v760_v57  ;;  %v1939_v58 = vld [vmem:[%s2056_s6] ss:$0 sm:$0xff] }
 0x102   :  { %1027 = vmatpush.msra.mxu1 %v1645_v36 }
 0x103   :  { %vm787_vm12 = vcmp.ge.f32.partialorder %v785_v59, 0.0 }
 0x104   :  { %v1205_v63 = vsel %vm787_vm12, 1.0, %v1274_v25  ;;  %v882_v7 = vpop.f32.mrf.mxu2  ;;  %1028 = vmatpush.msra.mxu1 %v1655_v38 }
 0x105   :  { %v795_v13 = vmul.f32 6.6666665, %v1205_v63  ;;  %v861_v14 = vmul.f32 0.35, %v1205_v63  ;;  %v883_v34 = vadd.f32 %v1723_v43, %v882_v7 }
 0x106   :  { %v782_v19 = vpop.f32.mrf.mxu0  ;;  %1029 = vmatpush.msra.mxu1 %v1667_v0 }
 0x107   :  { %v797_v22 = vadd.f32 %v795_v13, %v793_v5  ;;  %v783_v28 = vadd.f32 %v1723_v43, %v782_v19  ;;  %v863_v29 = vsub.f32 %v859_v18, %v861_v14 }
 0x108   :  { %1030 = vmatpush.msra.mxu1 %v1672_v1 }
 0x109   :  { %v801_v30 = vmul.f32 10.0, %v797_v22  ;;  %v786_v32 = vadd.f32 %v783_v28, %v761_v23  ;;  %v888_v33 = vadd.f32 %v883_v34, %v863_v29  ;;  %v896_v6 = vmul.f32 0.85, %v797_v22 }
 0x10a   :  { %1031 = vmatpush.msra.mxu1 %v1682_v3 }
 0x10b   :  { %vm788_vm13 = vcmp.ge.f32.partialorder %v786_v32, 0.0  ;;  %vm890_vm14 = vcmp.ge.f32.partialorder %v888_v33, 0.0  ;;  %v803_v37 = vadd.f32 %v801_v30, %v799_v35 }
 0x10c   :  { %v1206_v36 = vsel %vm788_vm13, 1.0, %v1274_v25  ;;  %v1211_v39 = vsel %vm890_vm14, 1.0, %v1274_v25  ;;  %v885_v40 = vpop.f32.mrf.mxu2  ;;  %1032 = vmatpush.msra.mxu1 %v1690_v4  ;;  %v962_v4 = vmul.f32 0.65, %v863_v29 }
 0x10d   :  { %v796_v38 = vmul.f32 6.6666665, %v1206_v36  ;;  %v862_v9 = vmul.f32 0.35, %v1206_v36  ;;  %v898_v11 = vmul.f32 6.6666665, %v1211_v39  ;;  %827 = vmatmul.f32.vlgmr.msrb.gmra.mxu1 %v803_v37  ;;  %v886_v41 = vadd.f32 %v1723_v43, %v885_v40 }
 0x10e   :  { %v902_v44 = vmul.f32 0.9, %v803_v37  ;;  %v964_v48 = vmul.f32 0.35, %v1211_v39 }
 0x10f   :  { %v900_v0 = vadd.f32 %v898_v11, %v896_v6  ;;  %v864_v12 = vsub.f32 %v860_v2, %v862_v9  ;;  %v798_v42 = vadd.f32 %v796_v38, %v794_v8 }
 0x110   :  { %v966_v51 = vsub.f32 %v962_v4, %v964_v48 }
 0x111   :  { %v904_v20 = vmul.f32 10.0, %v900_v0  ;;  %v889_v21 = vadd.f32 %v886_v41, %v864_v12  ;;  %v802_v15 = vmul.f32 10.0, %v798_v42  ;;  %v897_v3 = vmul.f32 0.85, %v798_v42 }
 0x112   :  { %v999_v54 = vmul.f32 0.85, %v900_v0  ;;  %v963_v57 = vmul.f32 0.65, %v864_v12 }
 0x113   :  { %vm891_vm15 = vcmp.ge.f32.partialorder %v889_v21, 0.0  ;;  %v804_v1 = vadd.f32 %v802_v15, %v800_v16  ;;  %v906_v45 = vadd.f32 %v904_v20, %v902_v44 }
 0x114   :  { %v1212_v46 = vsel %vm891_vm15, 1.0, %v1274_v25 }
 0x115   :  { %v899_v56 = vmul.f32 6.6666665, %v1212_v46  ;;  %830 = vmatmul.f32.gmra.mxu1 %v804_v1  ;;  %930 = vmatmul.f32.vlgmr.msrb.gmra.mxu3 %v906_v45  ;;  %v903_v47 = vmul.f32 0.9, %v804_v1  ;;  %v965_v53 = vmul.f32 0.35, %v1212_v46 }
 0x116   :  { %v1005_v7 = vmul.f32 0.9, %v906_v45 }
 0x117   :  { %v901_v26 = vadd.f32 %v899_v56, %v897_v3  ;;  %v967_v61 = vsub.f32 %v963_v57, %v965_v53 }
 0x119   :  { %v905_v60 = vmul.f32 10.0, %v901_v26  ;;  %v1000_v19 = vmul.f32 0.85, %v901_v26 }
 0x11b   :  { %v907_v49 = vadd.f32 %v905_v60, %v903_v47 }
 0x11d   :  { %933 = vmatmul.f32.gmra.mxu3 %v907_v49  ;;  %v1006_v23 = vmul.f32 0.9, %v907_v49 }
 0x11e   :  { %v985_v50 = vpop.f32.mrf.mxu0 }
 0x11f   :  { %v986_v62 = vadd.f32 %v1723_v43, %v985_v50 }
 0x121   :  { %v991_v52 = vadd.f32 %v986_v62, %v966_v51 }
 0x123   :  { %vm993_vm0 = vcmp.ge.f32.partialorder %v991_v52, 0.0 }
 0x124   :  { %v1217_v10 = vsel %vm993_vm0, 1.0, %v1274_v25  ;;  %1221 = vmatmul.msk.f32.vlgmr.msra.gmra.mxu2 %vm993_vm0, %v1275_v17  ;;  %v147_v63 = vpop.f32.mrf.mxu1 }
 0x125   :  { %v1001_v55 = vmul.f32 6.6666665, %v1217_v10  ;;  %v148_v13 = vadd.f32 %v1939_v58, %v147_v63 }
 0x126   :  { %v988_v24 = vpop.f32.mrf.mxu0 }
 0x127   :  { %v1003_v59 = vadd.f32 %v1001_v55, %v999_v54  ;;  %v989_v27 = vadd.f32 %v1723_v43, %v988_v24  ;;  %vm155_vm2 = vcmp.ge.f32.partialorder %v148_v13, 0.0  ;;  %v1113_v13 = vld [vmem:[%s2060_s7 + $0x78] sm:$0xff] }
 0x128   :  { %v1173_v43 = vsel %vm155_vm2, 1.0, %v1274_v25  ;;  %1118 = vmatpush.msra.mxu3 %v1113_v13 }
 0x129   :  { %v1007_v5 = vmul.f32 10.0, %v1003_v59  ;;  %v992_v31 = vadd.f32 %v989_v27, %v967_v61  ;;  %v276_v33 = vmul.f32 0.35, %v1173_v43  ;;  %v1111_v43 = vld [vmem:[%s2060_s7 + $0x68] sm:$0xff] }
 0x12b   :  { %vm994_vm1 = vcmp.ge.f32.partialorder %v992_v31, 0.0  ;;  %v1009_v14 = vadd.f32 %v1007_v5, %v1005_v7  ;;  %v278_v35 = vsub.f32 0.0, %v276_v33 }
 0x12c   :  { %v1218_v18 = vsel %vm994_vm1, 1.0, %v1274_v25  ;;  %1222 = vmatmul.msk.f32.gmra.mxu2 %vm994_vm1, %v1275_v17  ;;  %v150_v29 = vpop.f32.mrf.mxu1 }
 0x12d   :  { %v1002_v34 = vmul.f32 6.6666665, %v1218_v18  ;;  %1033 = vmatmul.f32.vlgmr.msra.gmra.mxu1 %v1009_v14  ;;  %v151_v30 = vadd.f32 %v1939_v58, %v150_v29  ;;  %v393_v41 = vmul.f32 0.65, %v278_v35  ;;  %v1112_v18 = vld [vmem:[%s2060_s7 + $0x70] sm:$0xff] }
 0x12e   :  { %1119 = vmatpush.msra.mxu3 %v1112_v18 }
 0x12f   :  { %v1004_v22 = vadd.f32 %v1002_v34, %v1000_v19  ;;  %vm156_vm3 = vcmp.ge.f32.partialorder %v151_v30, 0.0 }
 0x130   :  { %v1174_v2 = vsel %vm156_vm3, 1.0, %v1274_v25  ;;  %1120 = vmatpush.msra.mxu3 %v1111_v43 }
 0x131   :  { %v1008_v28 = vmul.f32 10.0, %v1004_v22  ;;  %v277_v6 = vmul.f32 0.35, %v1174_v2 }
 0x133   :  { %v1010_v32 = vadd.f32 %v1008_v28, %v1006_v23  ;;  %v279_v40 = vsub.f32 0.0, %v277_v6  ;;  %v1110_v28 = vld [vmem:[%s2060_s7 + $0x60] sm:$0xff] }
 0x134   :  { %1121 = vmatpush.msra.mxu3 %v1110_v28 }
 0x135   :  { %1036 = vmatmul.f32.gmra.mxu1 %v1010_v32  ;;  %v394_v21 = vmul.f32 0.65, %v279_v40  ;;  %v1109_v32 = vld [vmem:[%s2060_s7 + $0x58] sm:$0xff] }
 0x136   :  { %v313_v37 = vpop.f32.mrf.mxu3  ;;  %1122 = vmatpush.msra.mxu3 %v1109_v32 }
 0x137   :  { %v314_v36 = vadd.f32 %v1939_v58, %v313_v37  ;;  %v1108_v37 = vld [vmem:[%s2060_s7 + $0x50] sm:$0xff] }
 0x138   :  { %1123 = vmatpush.msra.mxu3 %v1108_v37 }
 0x139   :  { %v319_v39 = vadd.f32 %v314_v36, %v278_v35 }
 0x13b   :  { %vm321_vm4 = vcmp.ge.f32.partialorder %v319_v39, 0.0  ;;  %v1107_v39 = vld [vmem:[%s2060_s7 + $0x48] sm:$0xff] }
 0x13c   :  { %v1177_v38 = vsel %vm321_vm4, 1.0, %v1274_v25  ;;  %1124 = vmatpush.msra.mxu3 %v1107_v39 }
 0x13d   :  { %v395_v0 = vmul.f32 0.35, %v1177_v38 }
 0x13e   :  { %v316_v8 = vpop.f32.mrf.mxu3 }
 0x13f   :  { %v317_v9 = vadd.f32 %v1939_v58, %v316_v8  ;;  %v397_v12 = vsub.f32 %v393_v41, %v395_v0  ;;  %v1104_v0 = vld [vmem:[%s2060_s7 + $0x30] sm:$0xff] }
 0x141   :  { %v320_v11 = vadd.f32 %v317_v9, %v279_v40  ;;  %v496_v47 = vmul.f32 0.65, %v397_v12  ;;  %v1106_v40 = vld [vmem:[%s2060_s7 + $0x40] sm:$0xff]  ;;  %v1105_v9 = vld [vmem:[%s2060_s7 + $0x38] sm:$0xff] }
 0x142   :  { %1125 = vmatpush.msra.mxu3 %v1106_v40  ;;  %v1273_v40 = vld [vmem:[%s2059_s8] ss:$0 sm:$0xff] }
 0x143   :  { %vm322_vm5 = vcmp.ge.f32.partialorder %v320_v11, 0.0 }
 0x144   :  { %v1178_v16 = vsel %vm322_vm5, 1.0, %v1274_v25  ;;  %1126 = vmatpush.msra.mxu3 %v1105_v9 }
 0x145   :  { %v396_v44 = vmul.f32 0.35, %v1178_v16  ;;  %v1103_v16 = vld [vmem:[%s2060_s7 + $0x28] sm:$0xff] }
 0x146   :  { %1127 = vmatpush.msra.mxu3 %v1104_v0 }
 0x147   :  { %v398_v1 = vsub.f32 %v394_v21, %v396_v44  ;;  %v1102_v21 = vld [vmem:[%s2060_s7 + $0x20] sm:$0xff]  ;;  %v1101_v44 = vld [vmem:[%s2060_s7 + $0x18] sm:$0xff] }
 0x148   :  { %1128 = vmatpush.msra.mxu3 %v1103_v16 }
 0x149   :  { %v497_v62 = vmul.f32 0.65, %v398_v1 }
 0x14a   :  { %v416_v42 = vpop.f32.mrf.mxu1  ;;  %1129 = vmatpush.msra.mxu3 %v1102_v21 }
 0x14b   :  { %v417_v20 = vadd.f32 %v1939_v58, %v416_v42 }
 0x14c   :  { %1130 = vmatpush.msra.mxu3 %v1101_v44 }
 0x14d   :  { %v422_v15 = vadd.f32 %v417_v20, %v397_v12 }
 0x14f   :  { %vm424_vm6 = vcmp.ge.f32.partialorder %v422_v15, 0.0 }
 0x150   :  { %v1183_v56 = vsel %vm424_vm6, 1.0, %v1274_v25 }
 0x151   :  { %v498_v26 = vmul.f32 0.35, %v1183_v56 }
 0x152   :  { %v419_v45 = vpop.f32.mrf.mxu1 }
 0x153   :  { %v420_v46 = vadd.f32 %v1939_v58, %v419_v45  ;;  %v500_v4 = vsub.f32 %v496_v47, %v498_v26  ;;  %v1099_v47 = vld [vmem:[%s2060_s7 + $0x8] sm:$0xff] }
 0x155   :  { %v423_v3 = vadd.f32 %v420_v46, %v398_v1  ;;  %v599_v24 = vmul.f32 0.65, %v500_v4  ;;  %v1100_v46 = vld [vmem:[%s2060_s7 + $0x10] sm:$0xff] }
 0x156   :  { %1131 = vmatpush.msra.mxu3 %v1100_v46 }
 0x157   :  { %vm425_vm7 = vcmp.ge.f32.partialorder %v423_v3, 0.0 }
 0x158   :  { %v519_v60 = vpop.f32.mrf.mxu3  ;;  %v1184_v49 = vsel %vm425_vm7, 1.0, %v1274_v25  ;;  %1132 = vmatpush.msra.mxu3 %v1099_v47 }
 0x159   :  { %v520_v48 = vadd.f32 %v1939_v58, %v519_v60  ;;  %v499_v51 = vmul.f32 0.35, %v1184_v49 }
 0x15b   :  { %v525_v50 = vadd.f32 %v520_v48, %v500_v4  ;;  %v501_v52 = vsub.f32 %v497_v62, %v499_v51  ;;  %v1098_v48 = vld [vmem:[%s2060_s7] sm:$0xff] }
 0x15c   :  { %1133 = vmatpush.msra.mxu3 %v1098_v48 }
 0x15d   :  { %vm527_vm8 = vcmp.ge.f32.partialorder %v525_v50, 0.0  ;;  %v600_v7 = vmul.f32 0.65, %v501_v52 }
 0x15e   :  { %v1189_v54 = vsel %vm527_vm8, 1.0, %v1274_v25 }
 0x15f   :  { %v601_v57 = vmul.f32 0.35, %v1189_v54 }
 0x160   :  { %v522_v53 = vpop.f32.mrf.mxu3 }
 0x161   :  { %v523_v10 = vadd.f32 %v1939_v58, %v522_v53  ;;  %v603_v27 = vsub.f32 %v599_v24, %v601_v57 }
 0x163   :  { %v526_v55 = vadd.f32 %v523_v10, %v501_v52  ;;  %v702_v33 = vmul.f32 0.65, %v603_v27 }
 0x165   :  { %vm528_vm9 = vcmp.ge.f32.partialorder %v526_v55, 0.0 }
 0x166   :  { %v1190_v63 = vsel %vm528_vm9, 1.0, %v1274_v25 }
 0x167   :  { %v602_v31 = vmul.f32 0.35, %v1190_v63 }
 0x169   :  { %v604_v34 = vsub.f32 %v600_v7, %v602_v31 }
 0x16a   :  { %v622_v59 = vpop.f32.mrf.mxu1 }
 0x16b   :  { %v623_v61 = vadd.f32 %v1939_v58, %v622_v59  ;;  %v703_v11 = vmul.f32 0.65, %v604_v34 }
 0x16d   :  { %v628_v5 = vadd.f32 %v623_v61, %v603_v27 }
 0x16f   :  { %vm630_vm10 = vcmp.ge.f32.partialorder %v628_v5, 0.0 }
 0x170   :  { %v1195_v22 = vsel %vm630_vm10, 1.0, %v1274_v25 }
 0x171   :  { %v704_v29 = vmul.f32 0.35, %v1195_v22 }
 0x172   :  { %v625_v14 = vpop.f32.mrf.mxu1 }
 0x173   :  { %v626_v19 = vadd.f32 %v1939_v58, %v625_v14  ;;  %v706_v2 = vsub.f32 %v702_v33, %v704_v29  ;;  %v1272_v14 = vld [vmem:[%s2058_s4] ss:$0 sm:$0xff] }
 0x175   :  { %v629_v23 = vadd.f32 %v626_v19, %v604_v34  ;;  %v805_v1 = vmul.f32 0.65, %v706_v2 }
 0x177   :  { %vm631_vm11 = vcmp.ge.f32.partialorder %v629_v23, 0.0 }
 0x178   :  { %v725_v30 = vpop.f32.mrf.mxu3  ;;  %v1196_v36 = vsel %vm631_vm11, 1.0, %v1274_v25 }
 0x179   :  { %v726_v35 = vadd.f32 %v1939_v58, %v725_v30  ;;  %v705_v8 = vmul.f32 0.35, %v1196_v36 }
 0x17b   :  { %v731_v6 = vadd.f32 %v726_v35, %v706_v2  ;;  %v707_v12 = vsub.f32 %v703_v11, %v705_v8 }
 0x17d   :  { %vm733_vm12 = vcmp.ge.f32.partialorder %v731_v6, 0.0  ;;  %v806_v4 = vmul.f32 0.65, %v707_v12 }
 0x17e   :  { %v1201_v42 = vsel %vm733_vm12, 1.0, %v1274_v25 }
 0x17f   :  { %v807_v15 = vmul.f32 0.35, %v1201_v42 }
 0x180   :  { %v728_v38 = vpop.f32.mrf.mxu3 }
 0x181   :  { %v729_v41 = vadd.f32 %v1939_v58, %v728_v38  ;;  %v809_v56 = vsub.f32 %v805_v1, %v807_v15 }
 0x183   :  { %v732_v20 = vadd.f32 %v729_v41, %v707_v12  ;;  %v908_v55 = vmul.f32 0.65, %v809_v56 }
 0x185   :  { %vm734_vm13 = vcmp.ge.f32.partialorder %v732_v20, 0.0 }
 0x186   :  { %v1202_v26 = vsel %vm734_vm13, 1.0, %v1274_v25 }
 0x187   :  { %v808_v49 = vmul.f32 0.35, %v1202_v26 }
 0x189   :  { %v810_v51 = vsub.f32 %v806_v4, %v808_v49 }
 0x18a   :  { %v828_v45 = vpop.f32.mrf.mxu1 }
 0x18b   :  { %v829_v3 = vadd.f32 %v1939_v58, %v828_v45  ;;  %v909_v5 = vmul.f32 0.65, %v810_v51 }
 0x18d   :  { %v834_v60 = vadd.f32 %v829_v3, %v809_v56 }
 0x18f   :  { %vm836_vm14 = vcmp.ge.f32.partialorder %v834_v60, 0.0 }
 0x190   :  { %v1207_v52 = vsel %vm836_vm14, 1.0, %v1274_v25 }
 0x191   :  { %v910_v10 = vmul.f32 0.35, %v1207_v52 }
 0x192   :  { %v831_v50 = vpop.f32.mrf.mxu1 }
 0x193   :  { %v832_v62 = vadd.f32 %v1939_v58, %v831_v50  ;;  %v912_v24 = vsub.f32 %v908_v55, %v910_v10 }
 0x195   :  { %v835_v53 = vadd.f32 %v832_v62, %v810_v51  ;;  %v1011_v43 = vmul.f32 0.65, %v912_v24 }
 0x197   :  { %vm837_vm15 = vcmp.ge.f32.partialorder %v835_v53, 0.0 }
 0x198   :  { %v931_v54 = vpop.f32.mrf.mxu3  ;;  %v1208_v59 = vsel %vm837_vm15, 1.0, %v1274_v25 }
 0x199   :  { %v932_v57 = vadd.f32 %v1939_v58, %v931_v54  ;;  %v911_v61 = vmul.f32 0.35, %v1208_v59 }
 0x19b   :  { %v937_v27 = vadd.f32 %v932_v57, %v912_v24  ;;  %v913_v7 = vsub.f32 %v909_v5, %v911_v61 }
 0x19d   :  { %vm939_vm0 = vcmp.ge.f32.partialorder %v937_v27, 0.0  ;;  %v1012_v2 = vmul.f32 0.65, %v913_v7 }
 0x19e   :  { %v1213_v13 = vsel %vm939_vm0, 1.0, %v1274_v25 }
 0x19f   :  { %v1013_v34 = vmul.f32 0.35, %v1213_v13 }
 0x1a0   :  { %v934_v63 = vpop.f32.mrf.mxu3 }
 0x1a1   :  { %v935_v31 = vadd.f32 %v1939_v58, %v934_v63  ;;  %v1015_v28 = vsub.f32 %v1011_v43, %v1013_v34 }
 0x1a3   :  { %v938_v18 = vadd.f32 %v935_v31, %v913_v7 }
 0x1a5   :  { %vm940_vm1 = vcmp.ge.f32.partialorder %v938_v18, 0.0 }
 0x1a6   :  { %v1214_v30 = vsel %vm940_vm1, 1.0, %v1274_v25 }
 0x1a7   :  { %v1090_v19 = vpop.f32.mrf.mxu2  ;;  %v1014_v33 = vmul.f32 0.35, %v1214_v30 }
 0x1a8   :  { %v1091_v22 = vadd.f32 %v1272_v14, %v1090_v19 }
 0x1a9   :  { %v1016_v39 = vsub.f32 %v1012_v2, %v1014_v33 }
 0x1aa   :  { %1096 = vst [vmem:[%s2061_s10] sm:$0xff] %v1091_v22  ;;  %v1034_v23 = vpop.f32.mrf.mxu1 }
 0x1ab   :  { %v1035_v29 = vadd.f32 %v1939_v58, %v1034_v23 }
 0x1ad   :  { %v1040_v32 = vadd.f32 %v1035_v29, %v1015_v28 }
 0x1af   :  { %vm1042_vm2 = vcmp.ge.f32.partialorder %v1040_v32, 0.0  ;;  %1051 = vst [vmem:[%s2062_s9] sm:$0xff] %v1040_v32  ;;  %v1093_v35 = vpop.f32.mrf.mxu2 }
 0x1b0   :  { %v1094_v37 = vadd.f32 %v1272_v14, %v1093_v35  ;;  %1223 = vmatmul.msk.f32.vlgmr.msra.gmra.mxu3 %vm1042_vm2, %v1275_v17 }
 0x1b2   :  { %1097 = vst [vmem:[%s2061_s10 + $0x8] sm:$0xff] %v1094_v37  ;;  %v1037_v36 = vpop.f32.mrf.mxu1 }
 0x1b3   :  { %v1038_v25 = vadd.f32 %v1939_v58, %v1037_v36 }
 0x1b5   :  { %v1041_v6 = vadd.f32 %v1038_v25, %v1016_v39 }
 0x1b7   :  { %1052 = vst [vmem:[%s2062_s9 + $0x8] sm:$0xff] %v1041_v6  ;;  %vm1043_vm3 = vcmp.ge.f32.partialorder %v1041_v6, 0.0 }
 0x1b8   :  { %1224 = vmatmul.msk.f32.gmra.mxu3 %vm1043_vm3, %v1275_v17 }
 0x233   :  { %v1135_v8 = vpop.f32.mrf.mxu3 }
 0x234   :  { %v1136_v38 = vadd.f32 %v1273_v40, %v1135_v8 }
 0x236   :  { %1141 = vst [vmem:[%s2063_s11] sm:$0xff] %v1136_v38 }
 0x23b   :  { %v1138_v9 = vpop.f32.mrf.mxu3 }
 0x23c   :  { %v1139_v58 = vadd.f32 %v1273_v40, %v1138_v9 }
 0x23e   :  { %1142 = vst [vmem:[%s2063_s11 + $0x8] sm:$0xff] %v1139_v58 }

</bundles_post_ra>
